<compile_context>
chip_gen: v7x
topology: tpu7x:2x2x1
jax: 0.10.0
libtpu: 0.0.40
codegen_flags: <defaults>
</compile_context>

<pallas_src>
import jax
import jax.numpy as jnp
from jax.experimental import pallas as pl
from jax.experimental.pallas import tpu as pltpu

HIDDEN = 64      # self.hidden_size in the PyTorch module
GATE_PAD = 128   # per-gate lane width (one full vreg lane slot)


def _sigmoid(v):
    # logistic(x) == 0.5 * (1 + tanh(x / 2)) exactly; single EUP op per call.
    return 0.5 * (jnp.tanh(0.5 * v) + 1.0)


def gru_words_kernel(x_ref, w_i_ref, w_h_ref, b_gi_ref, b_hn_ref,
                     w_out_ref, b_out_ref, y_ref, gi_ref):
    """Whole forward in one invocation.

    x_ref:     (T*B, F)       time-major, batch-padded, flattened
    w_i_ref:   (F, 3*HP)      fused [r|z|n] input weights, each gate lane-padded
    w_h_ref:   (HP, 3*HP)     fused [r|z|n] hidden weights, lane/row padded
    b_gi_ref:  (1, 3*HP)      [b_ir+b_hr | b_iz+b_hz | b_in], lane-padded
    b_hn_ref:  (1, HP)        b_hn (separate because of r * (gh_n + b_hn))
    w_out_ref: (HP, OUT_PAD)  lane-padded output head
    b_out_ref: (1, OUT_PAD)
    y_ref:     (B, OUT_PAD)
    gi_ref:    (T, B, 3*HP)   VMEM scratch holding all input projections
    """
    T, B, _ = gi_ref.shape
    HP = w_h_ref.shape[0]               # padded per-gate width (128)

    # ---- Phase 1 (non-recurrent): all T*B input projections in one matmul.
    gi = (jnp.dot(x_ref[...], w_i_ref[...], preferred_element_type=jnp.float32)
          + b_gi_ref[...])
    gi_ref[...] = gi.reshape(gi_ref.shape)

    w_h = w_h_ref[...]                  # (HP, 3*HP), stays resident
    b_hn = b_hn_ref[...]                # (1, HP)

    # ---- Phase 2 (recurrent): only h @ W_hh + gate math on the serial path.
    # All gate slices below start at multiples of 128 lanes -> vreg aligned.
    def step(t, h_prev):
        gi_t = gi_ref[t]                                        # (B, 3*HP)
        gh = jnp.dot(h_prev, w_h,
                     preferred_element_type=jnp.float32)        # (B, 3*HP)
        r = _sigmoid(gi_t[:, 0:HP] + gh[:, 0:HP])
        z = _sigmoid(gi_t[:, HP:2 * HP] + gh[:, HP:2 * HP])
        n = jnp.tanh(gi_t[:, 2 * HP:3 * HP] + r * (gh[:, 2 * HP:3 * HP] + b_hn))
        return (1.0 - z) * n + z * h_prev

    h0 = jnp.zeros((B, HP), jnp.float32)
    unroll = T if T <= 16 else 8        # serial chain: cap the unroll factor
    h_T = jax.lax.fori_loop(0, T, step, h0, unroll=unroll)

    # ---- Fused output head (y = Linear(h_T)), lane-dense 128-wide store.
    y_ref[...] = (
        jnp.dot(h_T, w_out_ref[...], preferred_element_type=jnp.float32)
        + b_out_ref[...]
    ).astype(y_ref.dtype)


@jax.jit
def words_rnn_forward(x, w_ih, w_hh, b_ih, b_hh, w_out, b_out):
    """x: (B, T, F) float32.  Returns y: (1, B, out_features) like PyTorch."""
    B, T, F = x.shape
    H = HIDDEN
    HP = GATE_PAD
    out_features = w_out.shape[1]

    B_pad = ((B + 7) // 8) * 8                          # sublane groups
    OUT_PAD = ((out_features + 127) // 128) * 128       # lane-dense store
    pad_h = HP - H

    # time-major, batch-padded, flattened (T*B_pad, F).  At these tiny shapes
    # the transpose/pad is negligible; at scale, consume x in native layout or
    # enable allow_input_fusion to avoid the extra HBM pass.
    x_tm = jnp.transpose(x, (1, 0, 2))                          # (T, B, F)
    x_tm = jnp.pad(x_tm, ((0, 0), (0, B_pad - B), (0, 0)))      # (T, B_pad, F)
    x2d = x_tm.reshape(T * B_pad, F)

    # Fuse the three gates [r, z, n]; pad each gate to a full 128-lane slot.
    w_i = jnp.transpose(jnp.pad(w_ih, ((0, 0), (0, 0), (0, pad_h))),
                        (1, 0, 2)).reshape(F, 3 * HP)
    w_h = jnp.transpose(jnp.pad(w_hh, ((0, 0), (0, pad_h), (0, pad_h))),
                        (1, 0, 2)).reshape(HP, 3 * HP)

    # pre-summed r/z biases; n-gate keeps its hidden bias separate
    b_gi = jnp.concatenate([
        jnp.pad(b_ih[0] + b_hh[0], (0, pad_h)),
        jnp.pad(b_ih[1] + b_hh[1], (0, pad_h)),
        jnp.pad(b_ih[2], (0, pad_h)),
    ])[None, :]                                                 # (1, 3*HP)
    b_hn = jnp.pad(b_hh[2], (0, pad_h))[None, :]                # (1, HP)

    # row/lane-pad the output head
    w_out_p = jnp.pad(w_out, ((0, pad_h), (0, OUT_PAD - out_features)))
    b_out_p = jnp.pad(b_out, ((0, OUT_PAD - out_features),))[None, :]

    # Explicit VMEM bound (matters most on v7x: 64 MiB physical VMEM).
    operand_bytes = 4 * (x2d.size + w_i.size + w_h.size + b_gi.size
                         + b_hn.size + w_out_p.size + b_out_p.size
                         + B_pad * OUT_PAD + T * B_pad * 3 * HP)
    vmem_limit = int(min(100 * 2**20, max(4 * 2**20, 4 * operand_bytes)))

    y = pl.pallas_call(
        gru_words_kernel,
        out_shape=jax.ShapeDtypeStruct((B_pad, OUT_PAD), jnp.float32),
        grid_spec=pltpu.PrefetchScalarGridSpec(
            num_scalar_prefetch=0,
            grid=(1,),  # single invocation: recurrence is the in-kernel loop
            in_specs=[
                pl.BlockSpec((T * B_pad, F), lambda i: (0, 0)),      # x (flat)
                pl.BlockSpec((F, 3 * HP), lambda i: (0, 0)),         # W_ih fused
                pl.BlockSpec((HP, 3 * HP), lambda i: (0, 0)),        # W_hh fused
                pl.BlockSpec((1, 3 * HP), lambda i: (0, 0)),         # b_gi
                pl.BlockSpec((1, HP), lambda i: (0, 0)),             # b_hn
                pl.BlockSpec((HP, OUT_PAD), lambda i: (0, 0)),       # W_out^T
                pl.BlockSpec((1, OUT_PAD), lambda i: (0, 0)),        # b_out
            ],
            out_specs=pl.BlockSpec((B_pad, OUT_PAD), lambda i: (0, 0)),
            scratch_shapes=[pltpu.VMEM((T, B_pad, 3 * HP), jnp.float32)],
        ),
        compiler_params=pltpu.CompilerParams(
            dimension_semantics=("arbitrary",),
            vmem_limit_bytes=vmem_limit),
    )(x2d, w_i, w_h, b_gi, b_hn, w_out_p, b_out_p)

    # strip batch / lane padding; match PyTorch Linear(h) on h of shape (1,B,H)
    return y[:B, :out_features][None, :, :]


def init_params(key, in_features, out_features, hidden=HIDDEN):
    """Deterministic init mimicking PyTorch's U(-1/sqrt(H), 1/sqrt(H))."""
    k = 1.0 / jnp.sqrt(jnp.float32(hidden))
    keys = jax.random.split(key, 6)
    u = lambda kk, shape: jax.random.uniform(kk, shape, jnp.float32, -k, k)
    # per-gate transposed layout, gate order [r, z, n]
    w_ih = u(keys[0], (3, in_features, hidden))
    w_hh = u(keys[1], (3, hidden, hidden))
    b_ih = u(keys[2], (3, hidden))
    b_hh = u(keys[3], (3, hidden))
    w_out = u(keys[4], (hidden, out_features))
    b_out = u(keys[5], (out_features,))
    return w_ih, w_hh, b_ih, b_hh, w_out, b_out


def ref_forward(x, w_ih, w_hh, b_ih, b_hh, w_out, b_out):
    """Pure-JAX reference (lax.scan GRU, PyTorch gate order) for checking."""
    B, T, F = x.shape
    H = HIDDEN

    def step(h, x_t):
        gi = jnp.einsum('bf,gfh->gbh', x_t, w_ih) + b_ih[:, None, :]
        gh = jnp.einsum('bh,ghk->gbk', h, w_hh) + b_hh[:, None, :]
        r = jax.nn.sigmoid(gi[0] + gh[0])
        z = jax.nn.sigmoid(gi[1] + gh[1])
        n = jnp.tanh(gi[2] + r * gh[2])
        h_new = (1.0 - z) * n + z * h
        return h_new, None

    h0 = jnp.zeros((B, H), jnp.float32)
    h, _ = jax.lax.scan(step, h0, jnp.transpose(x, (1, 0, 2)))
    return (h @ w_out + b_out)[None, :, :]


if __name__ == "__main__":
    B, T = 2, 8
    in_features, out_features = 16, 32

    key = jax.random.PRNGKey(0)
    k_x, k_p = jax.random.split(key)
    x = jax.random.normal(k_x, (B, T, in_features), jnp.float32)
    params = init_params(k_p, in_features, out_features)

    y = words_rnn_forward(x, *params)
    y = jax.block_until_ready(y)

    y_ref = ref_forward(x, *params)
    assert y.shape == (1, B, out_features), y.shape
    assert jnp.allclose(y, y_ref, atol=1e-4, rtol=1e-4), \
        f"max abs err {jnp.max(jnp.abs(y - y_ref))}"

    print("KERNEL_OK")
</pallas_src>

<mosaic_0001>
module attributes {stable_mosaic.version = 11 : i64} {
  func.func @gru_words_kernel(%arg0: i32, %arg1: memref<64x16xf32, #tpu.memory_space<vmem>>, %arg2: memref<16x384xf32, #tpu.memory_space<vmem>>, %arg3: memref<128x384xf32, #tpu.memory_space<vmem>>, %arg4: memref<1x384xf32, #tpu.memory_space<vmem>>, %arg5: memref<1x128xf32, #tpu.memory_space<vmem>>, %arg6: memref<128x128xf32, #tpu.memory_space<vmem>>, %arg7: memref<1x128xf32, #tpu.memory_space<vmem>>, %arg8: memref<8x128xf32, #tpu.memory_space<vmem>>, %arg9: memref<8x8x384xf32, #tpu.memory_space<vmem>>) attributes {dimension_semantics = [#tpu.dimension_semantics<arbitrary>], iteration_bounds = array<i64: 1>, scalar_prefetch = 0 : i64, scratch_operands = 1 : i64, tpu.core_type = #tpu.core_type<tc>, window_params = [{pipeline_mode = #tpu.pipeline_mode<synchronous>, transform_indices = @transform_0, window_bounds = array<i64: 64, 16>}, {pipeline_mode = #tpu.pipeline_mode<synchronous>, transform_indices = @transform_1, window_bounds = array<i64: 16, 384>}, {pipeline_mode = #tpu.pipeline_mode<synchronous>, transform_indices = @transform_2, window_bounds = array<i64: 128, 384>}, {pipeline_mode = #tpu.pipeline_mode<synchronous>, transform_indices = @transform_3, window_bounds = array<i64: 1, 384>}, {pipeline_mode = #tpu.pipeline_mode<synchronous>, transform_indices = @transform_4, window_bounds = array<i64: 1, 128>}, {pipeline_mode = #tpu.pipeline_mode<synchronous>, transform_indices = @transform_5, window_bounds = array<i64: 128, 128>}, {pipeline_mode = #tpu.pipeline_mode<synchronous>, transform_indices = @transform_6, window_bounds = array<i64: 1, 128>}, {pipeline_mode = #tpu.pipeline_mode<synchronous>, transform_indices = @transform_7, window_bounds = array<i64: 8, 128>}]} {
    %c0 = arith.constant 0 : index
    %c0_0 = arith.constant 0 : index
    %0 = vector.load %arg1[%c0, %c0_0] : memref<64x16xf32, #tpu.memory_space<vmem>>, vector<64x16xf32>
    %c0_1 = arith.constant 0 : index
    %c0_2 = arith.constant 0 : index
    %1 = vector.load %arg2[%c0_1, %c0_2] : memref<16x384xf32, #tpu.memory_space<vmem>>, vector<16x384xf32>
    %cst = arith.constant dense<0.000000e+00> : vector<64x384xf32>
    %2 = tpu.matmul %0, %1, %cst {dimension_numbers = #tpu.dot_dimension_numbers<[1], [0], [0], [1], [0, 0, 1, 1], [], []>} : vector<64x16xf32>, vector<16x384xf32>, vector<64x384xf32> -> vector<64x384xf32>
    %c0_3 = arith.constant 0 : index
    %c0_4 = arith.constant 0 : index
    %3 = vector.load %arg4[%c0_3, %c0_4] : memref<1x384xf32, #tpu.memory_space<vmem>>, vector<1x384xf32>
    %4 = vector.broadcast %3 : vector<1x384xf32> to vector<64x384xf32>
    %5 = arith.addf %2, %4 : vector<64x384xf32>
    %6 = vector.shape_cast %5 : vector<64x384xf32> to vector<8x8x384xf32>
    %c0_5 = arith.constant 0 : index
    %c0_6 = arith.constant 0 : index
    %c0_7 = arith.constant 0 : index
    %7 = vector.load %arg9[%c0_5, %c0_6, %c0_7] : memref<8x8x384xf32, #tpu.memory_space<vmem>>, vector<8x8x384xf32>
    tpu.vector_store %arg9[%c0_5, %c0_6, %c0_7], %6 {strides = array<i32>} : memref<8x8x384xf32, #tpu.memory_space<vmem>>, vector<8x8x384xf32>,
    %c0_8 = arith.constant 0 : index
    %c0_9 = arith.constant 0 : index
    %8 = vector.load %arg3[%c0_8, %c0_9] : memref<128x384xf32, #tpu.memory_space<vmem>>, vector<128x384xf32>
    %c0_10 = arith.constant 0 : index
    %c0_11 = arith.constant 0 : index
    %9 = vector.load %arg5[%c0_10, %c0_11] : memref<1x128xf32, #tpu.memory_space<vmem>>, vector<1x128xf32>
    %cst_12 = arith.constant 0.000000e+00 : f32
    %10 = vector.broadcast %cst_12 : f32 to vector<8x128xf32>
    %c0_i32 = arith.constant 0 : i32
    %11 = arith.index_cast %c0_i32 : i32 to index
    %c0_13 = arith.constant 0 : index
    %c0_14 = arith.constant 0 : index
    %12 = vector.load %arg9[%11, %c0_13, %c0_14] : memref<8x8x384xf32, #tpu.memory_space<vmem>>, vector<1x8x384xf32>
    %13 = vector.shape_cast %12 : vector<1x8x384xf32> to vector<8x384xf32>
    %cst_15 = arith.constant dense<0.000000e+00> : vector<8x384xf32>
    %14 = tpu.matmul %10, %8, %cst_15 {dimension_numbers = #tpu.dot_dimension_numbers<[1], [0], [0], [1], [0, 0, 1, 1], [], []>} : vector<8x128xf32>, vector<128x384xf32>, vector<8x384xf32> -> vector<8x384xf32>
    %15 = vector.extract_strided_slice %13 {offsets = [0, 0], sizes = [8, 128], strides = [1, 1]} : vector<8x384xf32> to vector<8x128xf32>
    %16 = vector.extract_strided_slice %14 {offsets = [0, 0], sizes = [8, 128], strides = [1, 1]} : vector<8x384xf32> to vector<8x128xf32>
    %17 = arith.addf %15, %16 : vector<8x128xf32>
    %cst_16 = arith.constant 5.000000e-01 : f32
    %18 = vector.broadcast %cst_16 : f32 to vector<8x128xf32>
    %19 = arith.mulf %18, %17 : vector<8x128xf32>
    %20 = math.tanh %19 : vector<8x128xf32>
    %cst_17 = arith.constant 1.000000e+00 : f32
    %21 = vector.broadcast %cst_17 : f32 to vector<8x128xf32>
    %22 = arith.addf %20, %21 : vector<8x128xf32>
    %cst_18 = arith.constant 5.000000e-01 : f32
    %23 = vector.broadcast %cst_18 : f32 to vector<8x128xf32>
    %24 = arith.mulf %23, %22 : vector<8x128xf32>
    %25 = vector.extract_strided_slice %13 {offsets = [0, 128], sizes = [8, 128], strides = [1, 1]} : vector<8x384xf32> to vector<8x128xf32>
    %26 = vector.extract_strided_slice %14 {offsets = [0, 128], sizes = [8, 128], strides = [1, 1]} : vector<8x384xf32> to vector<8x128xf32>
    %27 = arith.addf %25, %26 : vector<8x128xf32>
    %cst_19 = arith.constant 5.000000e-01 : f32
    %28 = vector.broadcast %cst_19 : f32 to vector<8x128xf32>
    %29 = arith.mulf %28, %27 : vector<8x128xf32>
    %30 = math.tanh %29 : vector<8x128xf32>
    %cst_20 = arith.constant 1.000000e+00 : f32
    %31 = vector.broadcast %cst_20 : f32 to vector<8x128xf32>
    %32 = arith.addf %30, %31 : vector<8x128xf32>
    %cst_21 = arith.constant 5.000000e-01 : f32
    %33 = vector.broadcast %cst_21 : f32 to vector<8x128xf32>
    %34 = arith.mulf %33, %32 : vector<8x128xf32>
    %35 = vector.extract_strided_slice %13 {offsets = [0, 256], sizes = [8, 128], strides = [1, 1]} : vector<8x384xf32> to vector<8x128xf32>
    %36 = vector.extract_strided_slice %14 {offsets = [0, 256], sizes = [8, 128], strides = [1, 1]} : vector<8x384xf32> to vector<8x128xf32>
    %37 = vector.broadcast %9 : vector<1x128xf32> to vector<8x128xf32>
    %38 = arith.addf %36, %37 : vector<8x128xf32>
    %39 = arith.mulf %24, %38 : vector<8x128xf32>
    %40 = arith.addf %35, %39 : vector<8x128xf32>
    %41 = math.tanh %40 : vector<8x128xf32>
    %cst_22 = arith.constant 1.000000e+00 : f32
    %42 = vector.broadcast %cst_22 : f32 to vector<8x128xf32>
    %43 = arith.subf %42, %34 : vector<8x128xf32>
    %44 = arith.mulf %43, %41 : vector<8x128xf32>
    %45 = arith.mulf %34, %10 : vector<8x128xf32>
    %46 = arith.addf %44, %45 : vector<8x128xf32>
    %c1_i32 = arith.constant 1 : i32
    %47 = arith.index_cast %c1_i32 : i32 to index
    %c0_23 = arith.constant 0 : index
    %c0_24 = arith.constant 0 : index
    %48 = vector.load %arg9[%47, %c0_23, %c0_24] : memref<8x8x384xf32, #tpu.memory_space<vmem>>, vector<1x8x384xf32>
    %49 = vector.shape_cast %48 : vector<1x8x384xf32> to vector<8x384xf32>
    %cst_25 = arith.constant dense<0.000000e+00> : vector<8x384xf32>
    %50 = tpu.matmul %46, %8, %cst_25 {dimension_numbers = #tpu.dot_dimension_numbers<[1], [0], [0], [1], [0, 0, 1, 1], [], []>} : vector<8x128xf32>, vector<128x384xf32>, vector<8x384xf32> -> vector<8x384xf32>
    %51 = vector.extract_strided_slice %49 {offsets = [0, 0], sizes = [8, 128], strides = [1, 1]} : vector<8x384xf32> to vector<8x128xf32>
    %52 = vector.extract_strided_slice %50 {offsets = [0, 0], sizes = [8, 128], strides = [1, 1]} : vector<8x384xf32> to vector<8x128xf32>
    %53 = arith.addf %51, %52 : vector<8x128xf32>
    %cst_26 = arith.constant 5.000000e-01 : f32
    %54 = vector.broadcast %cst_26 : f32 to vector<8x128xf32>
    %55 = arith.mulf %54, %53 : vector<8x128xf32>
    %56 = math.tanh %55 : vector<8x128xf32>
    %cst_27 = arith.constant 1.000000e+00 : f32
    %57 = vector.broadcast %cst_27 : f32 to vector<8x128xf32>
    %58 = arith.addf %56, %57 : vector<8x128xf32>
    %cst_28 = arith.constant 5.000000e-01 : f32
    %59 = vector.broadcast %cst_28 : f32 to vector<8x128xf32>
    %60 = arith.mulf %59, %58 : vector<8x128xf32>
    %61 = vector.extract_strided_slice %49 {offsets = [0, 128], sizes = [8, 128], strides = [1, 1]} : vector<8x384xf32> to vector<8x128xf32>
    %62 = vector.extract_strided_slice %50 {offsets = [0, 128], sizes = [8, 128], strides = [1, 1]} : vector<8x384xf32> to vector<8x128xf32>
    %63 = arith.addf %61, %62 : vector<8x128xf32>
    %cst_29 = arith.constant 5.000000e-01 : f32
    %64 = vector.broadcast %cst_29 : f32 to vector<8x128xf32>
    %65 = arith.mulf %64, %63 : vector<8x128xf32>
    %66 = math.tanh %65 : vector<8x128xf32>
    %cst_30 = arith.constant 1.000000e+00 : f32
    %67 = vector.broadcast %cst_30 : f32 to vector<8x128xf32>
    %68 = arith.addf %66, %67 : vector<8x128xf32>
    %cst_31 = arith.constant 5.000000e-01 : f32
    %69 = vector.broadcast %cst_31 : f32 to vector<8x128xf32>
    %70 = arith.mulf %69, %68 : vector<8x128xf32>
    %71 = vector.extract_strided_slice %49 {offsets = [0, 256], sizes = [8, 128], strides = [1, 1]} : vector<8x384xf32> to vector<8x128xf32>
    %72 = vector.extract_strided_slice %50 {offsets = [0, 256], sizes = [8, 128], strides = [1, 1]} : vector<8x384xf32> to vector<8x128xf32>
    %73 = vector.broadcast %9 : vector<1x128xf32> to vector<8x128xf32>
    %74 = arith.addf %72, %73 : vector<8x128xf32>
    %75 = arith.mulf %60, %74 : vector<8x128xf32>
    %76 = arith.addf %71, %75 : vector<8x128xf32>
    %77 = math.tanh %76 : vector<8x128xf32>
    %cst_32 = arith.constant 1.000000e+00 : f32
    %78 = vector.broadcast %cst_32 : f32 to vector<8x128xf32>
    %79 = arith.subf %78, %70 : vector<8x128xf32>
    %80 = arith.mulf %79, %77 : vector<8x128xf32>
    %81 = arith.mulf %70, %46 : vector<8x128xf32>
    %82 = arith.addf %80, %81 : vector<8x128xf32>
    %c2_i32 = arith.constant 2 : i32
    %83 = arith.index_cast %c2_i32 : i32 to index
    %c0_33 = arith.constant 0 : index
    %c0_34 = arith.constant 0 : index
    %84 = vector.load %arg9[%83, %c0_33, %c0_34] : memref<8x8x384xf32, #tpu.memory_space<vmem>>, vector<1x8x384xf32>
    %85 = vector.shape_cast %84 : vector<1x8x384xf32> to vector<8x384xf32>
    %cst_35 = arith.constant dense<0.000000e+00> : vector<8x384xf32>
    %86 = tpu.matmul %82, %8, %cst_35 {dimension_numbers = #tpu.dot_dimension_numbers<[1], [0], [0], [1], [0, 0, 1, 1], [], []>} : vector<8x128xf32>, vector<128x384xf32>, vector<8x384xf32> -> vector<8x384xf32>
    %87 = vector.extract_strided_slice %85 {offsets = [0, 0], sizes = [8, 128], strides = [1, 1]} : vector<8x384xf32> to vector<8x128xf32>
    %88 = vector.extract_strided_slice %86 {offsets = [0, 0], sizes = [8, 128], strides = [1, 1]} : vector<8x384xf32> to vector<8x128xf32>
    %89 = arith.addf %87, %88 : vector<8x128xf32>
    %cst_36 = arith.constant 5.000000e-01 : f32
    %90 = vector.broadcast %cst_36 : f32 to vector<8x128xf32>
    %91 = arith.mulf %90, %89 : vector<8x128xf32>
    %92 = math.tanh %91 : vector<8x128xf32>
    %cst_37 = arith.constant 1.000000e+00 : f32
    %93 = vector.broadcast %cst_37 : f32 to vector<8x128xf32>
    %94 = arith.addf %92, %93 : vector<8x128xf32>
    %cst_38 = arith.constant 5.000000e-01 : f32
    %95 = vector.broadcast %cst_38 : f32 to vector<8x128xf32>
    %96 = arith.mulf %95, %94 : vector<8x128xf32>
    %97 = vector.extract_strided_slice %85 {offsets = [0, 128], sizes = [8, 128], strides = [1, 1]} : vector<8x384xf32> to vector<8x128xf32>
    %98 = vector.extract_strided_slice %86 {offsets = [0, 128], sizes = [8, 128], strides = [1, 1]} : vector<8x384xf32> to vector<8x128xf32>
    %99 = arith.addf %97, %98 : vector<8x128xf32>
    %cst_39 = arith.constant 5.000000e-01 : f32
    %100 = vector.broadcast %cst_39 : f32 to vector<8x128xf32>
    %101 = arith.mulf %100, %99 : vector<8x128xf32>
    %102 = math.tanh %101 : vector<8x128xf32>
    %cst_40 = arith.constant 1.000000e+00 : f32
    %103 = vector.broadcast %cst_40 : f32 to vector<8x128xf32>
    %104 = arith.addf %102, %103 : vector<8x128xf32>
    %cst_41 = arith.constant 5.000000e-01 : f32
    %105 = vector.broadcast %cst_41 : f32 to vector<8x128xf32>
    %106 = arith.mulf %105, %104 : vector<8x128xf32>
    %107 = vector.extract_strided_slice %85 {offsets = [0, 256], sizes = [8, 128], strides = [1, 1]} : vector<8x384xf32> to vector<8x128xf32>
    %108 = vector.extract_strided_slice %86 {offsets = [0, 256], sizes = [8, 128], strides = [1, 1]} : vector<8x384xf32> to vector<8x128xf32>
    %109 = vector.broadcast %9 : vector<1x128xf32> to vector<8x128xf32>
    %110 = arith.addf %108, %109 : vector<8x128xf32>
    %111 = arith.mulf %96, %110 : vector<8x128xf32>
    %112 = arith.addf %107, %111 : vector<8x128xf32>
    %113 = math.tanh %112 : vector<8x128xf32>
    %cst_42 = arith.constant 1.000000e+00 : f32
    %114 = vector.broadcast %cst_42 : f32 to vector<8x128xf32>
    %115 = arith.subf %114, %106 : vector<8x128xf32>
    %116 = arith.mulf %115, %113 : vector<8x128xf32>
    %117 = arith.mulf %106, %82 : vector<8x128xf32>
    %118 = arith.addf %116, %117 : vector<8x128xf32>
    %c3_i32 = arith.constant 3 : i32
    %119 = arith.index_cast %c3_i32 : i32 to index
    %c0_43 = arith.constant 0 : index
    %c0_44 = arith.constant 0 : index
    %120 = vector.load %arg9[%119, %c0_43, %c0_44] : memref<8x8x384xf32, #tpu.memory_space<vmem>>, vector<1x8x384xf32>
    %121 = vector.shape_cast %120 : vector<1x8x384xf32> to vector<8x384xf32>
    %cst_45 = arith.constant dense<0.000000e+00> : vector<8x384xf32>
    %122 = tpu.matmul %118, %8, %cst_45 {dimension_numbers = #tpu.dot_dimension_numbers<[1], [0], [0], [1], [0, 0, 1, 1], [], []>} : vector<8x128xf32>, vector<128x384xf32>, vector<8x384xf32> -> vector<8x384xf32>
    %123 = vector.extract_strided_slice %121 {offsets = [0, 0], sizes = [8, 128], strides = [1, 1]} : vector<8x384xf32> to vector<8x128xf32>
    %124 = vector.extract_strided_slice %122 {offsets = [0, 0], sizes = [8, 128], strides = [1, 1]} : vector<8x384xf32> to vector<8x128xf32>
    %125 = arith.addf %123, %124 : vector<8x128xf32>
    %cst_46 = arith.constant 5.000000e-01 : f32
    %126 = vector.broadcast %cst_46 : f32 to vector<8x128xf32>
    %127 = arith.mulf %126, %125 : vector<8x128xf32>
    %128 = math.tanh %127 : vector<8x128xf32>
    %cst_47 = arith.constant 1.000000e+00 : f32
    %129 = vector.broadcast %cst_47 : f32 to vector<8x128xf32>
    %130 = arith.addf %128, %129 : vector<8x128xf32>
    %cst_48 = arith.constant 5.000000e-01 : f32
    %131 = vector.broadcast %cst_48 : f32 to vector<8x128xf32>
    %132 = arith.mulf %131, %130 : vector<8x128xf32>
    %133 = vector.extract_strided_slice %121 {offsets = [0, 128], sizes = [8, 128], strides = [1, 1]} : vector<8x384xf32> to vector<8x128xf32>
    %134 = vector.extract_strided_slice %122 {offsets = [0, 128], sizes = [8, 128], strides = [1, 1]} : vector<8x384xf32> to vector<8x128xf32>
    %135 = arith.addf %133, %134 : vector<8x128xf32>
    %cst_49 = arith.constant 5.000000e-01 : f32
    %136 = vector.broadcast %cst_49 : f32 to vector<8x128xf32>
    %137 = arith.mulf %136, %135 : vector<8x128xf32>
    %138 = math.tanh %137 : vector<8x128xf32>
    %cst_50 = arith.constant 1.000000e+00 : f32
    %139 = vector.broadcast %cst_50 : f32 to vector<8x128xf32>
    %140 = arith.addf %138, %139 : vector<8x128xf32>
    %cst_51 = arith.constant 5.000000e-01 : f32
    %141 = vector.broadcast %cst_51 : f32 to vector<8x128xf32>
    %142 = arith.mulf %141, %140 : vector<8x128xf32>
    %143 = vector.extract_strided_slice %121 {offsets = [0, 256], sizes = [8, 128], strides = [1, 1]} : vector<8x384xf32> to vector<8x128xf32>
    %144 = vector.extract_strided_slice %122 {offsets = [0, 256], sizes = [8, 128], strides = [1, 1]} : vector<8x384xf32> to vector<8x128xf32>
    %145 = vector.broadcast %9 : vector<1x128xf32> to vector<8x128xf32>
    %146 = arith.addf %144, %145 : vector<8x128xf32>
    %147 = arith.mulf %132, %146 : vector<8x128xf32>
    %148 = arith.addf %143, %147 : vector<8x128xf32>
    %149 = math.tanh %148 : vector<8x128xf32>
    %cst_52 = arith.constant 1.000000e+00 : f32
    %150 = vector.broadcast %cst_52 : f32 to vector<8x128xf32>
    %151 = arith.subf %150, %142 : vector<8x128xf32>
    %152 = arith.mulf %151, %149 : vector<8x128xf32>
    %153 = arith.mulf %142, %118 : vector<8x128xf32>
    %154 = arith.addf %152, %153 : vector<8x128xf32>
    %c4_i32 = arith.constant 4 : i32
    %155 = arith.index_cast %c4_i32 : i32 to index
    %c0_53 = arith.constant 0 : index
    %c0_54 = arith.constant 0 : index
    %156 = vector.load %arg9[%155, %c0_53, %c0_54] : memref<8x8x384xf32, #tpu.memory_space<vmem>>, vector<1x8x384xf32>
    %157 = vector.shape_cast %156 : vector<1x8x384xf32> to vector<8x384xf32>
    %cst_55 = arith.constant dense<0.000000e+00> : vector<8x384xf32>
    %158 = tpu.matmul %154, %8, %cst_55 {dimension_numbers = #tpu.dot_dimension_numbers<[1], [0], [0], [1], [0, 0, 1, 1], [], []>} : vector<8x128xf32>, vector<128x384xf32>, vector<8x384xf32> -> vector<8x384xf32>
    %159 = vector.extract_strided_slice %157 {offsets = [0, 0], sizes = [8, 128], strides = [1, 1]} : vector<8x384xf32> to vector<8x128xf32>
    %160 = vector.extract_strided_slice %158 {offsets = [0, 0], sizes = [8, 128], strides = [1, 1]} : vector<8x384xf32> to vector<8x128xf32>
    %161 = arith.addf %159, %160 : vector<8x128xf32>
    %cst_56 = arith.constant 5.000000e-01 : f32
    %162 = vector.broadcast %cst_56 : f32 to vector<8x128xf32>
    %163 = arith.mulf %162, %161 : vector<8x128xf32>
    %164 = math.tanh %163 : vector<8x128xf32>
    %cst_57 = arith.constant 1.000000e+00 : f32
    %165 = vector.broadcast %cst_57 : f32 to vector<8x128xf32>
    %166 = arith.addf %164, %165 : vector<8x128xf32>
    %cst_58 = arith.constant 5.000000e-01 : f32
    %167 = vector.broadcast %cst_58 : f32 to vector<8x128xf32>
    %168 = arith.mulf %167, %166 : vector<8x128xf32>
    %169 = vector.extract_strided_slice %157 {offsets = [0, 128], sizes = [8, 128], strides = [1, 1]} : vector<8x384xf32> to vector<8x128xf32>
    %170 = vector.extract_strided_slice %158 {offsets = [0, 128], sizes = [8, 128], strides = [1, 1]} : vector<8x384xf32> to vector<8x128xf32>
    %171 = arith.addf %169, %170 : vector<8x128xf32>
    %cst_59 = arith.constant 5.000000e-01 : f32
    %172 = vector.broadcast %cst_59 : f32 to vector<8x128xf32>
    %173 = arith.mulf %172, %171 : vector<8x128xf32>
    %174 = math.tanh %173 : vector<8x128xf32>
    %cst_60 = arith.constant 1.000000e+00 : f32
    %175 = vector.broadcast %cst_60 : f32 to vector<8x128xf32>
    %176 = arith.addf %174, %175 : vector<8x128xf32>
    %cst_61 = arith.constant 5.000000e-01 : f32
    %177 = vector.broadcast %cst_61 : f32 to vector<8x128xf32>
    %178 = arith.mulf %177, %176 : vector<8x128xf32>
    %179 = vector.extract_strided_slice %157 {offsets = [0, 256], sizes = [8, 128], strides = [1, 1]} : vector<8x384xf32> to vector<8x128xf32>
    %180 = vector.extract_strided_slice %158 {offsets = [0, 256], sizes = [8, 128], strides = [1, 1]} : vector<8x384xf32> to vector<8x128xf32>
    %181 = vector.broadcast %9 : vector<1x128xf32> to vector<8x128xf32>
    %182 = arith.addf %180, %181 : vector<8x128xf32>
    %183 = arith.mulf %168, %182 : vector<8x128xf32>
    %184 = arith.addf %179, %183 : vector<8x128xf32>
    %185 = math.tanh %184 : vector<8x128xf32>
    %cst_62 = arith.constant 1.000000e+00 : f32
    %186 = vector.broadcast %cst_62 : f32 to vector<8x128xf32>
    %187 = arith.subf %186, %178 : vector<8x128xf32>
    %188 = arith.mulf %187, %185 : vector<8x128xf32>
    %189 = arith.mulf %178, %154 : vector<8x128xf32>
    %190 = arith.addf %188, %189 : vector<8x128xf32>
    %c5_i32 = arith.constant 5 : i32
    %191 = arith.index_cast %c5_i32 : i32 to index
    %c0_63 = arith.constant 0 : index
    %c0_64 = arith.constant 0 : index
    %192 = vector.load %arg9[%191, %c0_63, %c0_64] : memref<8x8x384xf32, #tpu.memory_space<vmem>>, vector<1x8x384xf32>
    %193 = vector.shape_cast %192 : vector<1x8x384xf32> to vector<8x384xf32>
    %cst_65 = arith.constant dense<0.000000e+00> : vector<8x384xf32>
    %194 = tpu.matmul %190, %8, %cst_65 {dimension_numbers = #tpu.dot_dimension_numbers<[1], [0], [0], [1], [0, 0, 1, 1], [], []>} : vector<8x128xf32>, vector<128x384xf32>, vector<8x384xf32> -> vector<8x384xf32>
    %195 = vector.extract_strided_slice %193 {offsets = [0, 0], sizes = [8, 128], strides = [1, 1]} : vector<8x384xf32> to vector<8x128xf32>
    %196 = vector.extract_strided_slice %194 {offsets = [0, 0], sizes = [8, 128], strides = [1, 1]} : vector<8x384xf32> to vector<8x128xf32>
    %197 = arith.addf %195, %196 : vector<8x128xf32>
    %cst_66 = arith.constant 5.000000e-01 : f32
    %198 = vector.broadcast %cst_66 : f32 to vector<8x128xf32>
    %199 = arith.mulf %198, %197 : vector<8x128xf32>
    %200 = math.tanh %199 : vector<8x128xf32>
    %cst_67 = arith.constant 1.000000e+00 : f32
    %201 = vector.broadcast %cst_67 : f32 to vector<8x128xf32>
    %202 = arith.addf %200, %201 : vector<8x128xf32>
    %cst_68 = arith.constant 5.000000e-01 : f32
    %203 = vector.broadcast %cst_68 : f32 to vector<8x128xf32>
    %204 = arith.mulf %203, %202 : vector<8x128xf32>
    %205 = vector.extract_strided_slice %193 {offsets = [0, 128], sizes = [8, 128], strides = [1, 1]} : vector<8x384xf32> to vector<8x128xf32>
    %206 = vector.extract_strided_slice %194 {offsets = [0, 128], sizes = [8, 128], strides = [1, 1]} : vector<8x384xf32> to vector<8x128xf32>
    %207 = arith.addf %205, %206 : vector<8x128xf32>
    %cst_69 = arith.constant 5.000000e-01 : f32
    %208 = vector.broadcast %cst_69 : f32 to vector<8x128xf32>
    %209 = arith.mulf %208, %207 : vector<8x128xf32>
    %210 = math.tanh %209 : vector<8x128xf32>
    %cst_70 = arith.constant 1.000000e+00 : f32
    %211 = vector.broadcast %cst_70 : f32 to vector<8x128xf32>
    %212 = arith.addf %210, %211 : vector<8x128xf32>
    %cst_71 = arith.constant 5.000000e-01 : f32
    %213 = vector.broadcast %cst_71 : f32 to vector<8x128xf32>
    %214 = arith.mulf %213, %212 : vector<8x128xf32>
    %215 = vector.extract_strided_slice %193 {offsets = [0, 256], sizes = [8, 128], strides = [1, 1]} : vector<8x384xf32> to vector<8x128xf32>
    %216 = vector.extract_strided_slice %194 {offsets = [0, 256], sizes = [8, 128], strides = [1, 1]} : vector<8x384xf32> to vector<8x128xf32>
    %217 = vector.broadcast %9 : vector<1x128xf32> to vector<8x128xf32>
    %218 = arith.addf %216, %217 : vector<8x128xf32>
    %219 = arith.mulf %204, %218 : vector<8x128xf32>
    %220 = arith.addf %215, %219 : vector<8x128xf32>
    %221 = math.tanh %220 : vector<8x128xf32>
    %cst_72 = arith.constant 1.000000e+00 : f32
    %222 = vector.broadcast %cst_72 : f32 to vector<8x128xf32>
    %223 = arith.subf %222, %214 : vector<8x128xf32>
    %224 = arith.mulf %223, %221 : vector<8x128xf32>
    %225 = arith.mulf %214, %190 : vector<8x128xf32>
    %226 = arith.addf %224, %225 : vector<8x128xf32>
    %c6_i32 = arith.constant 6 : i32
    %227 = arith.index_cast %c6_i32 : i32 to index
    %c0_73 = arith.constant 0 : index
    %c0_74 = arith.constant 0 : index
    %228 = vector.load %arg9[%227, %c0_73, %c0_74] : memref<8x8x384xf32, #tpu.memory_space<vmem>>, vector<1x8x384xf32>
    %229 = vector.shape_cast %228 : vector<1x8x384xf32> to vector<8x384xf32>
    %cst_75 = arith.constant dense<0.000000e+00> : vector<8x384xf32>
    %230 = tpu.matmul %226, %8, %cst_75 {dimension_numbers = #tpu.dot_dimension_numbers<[1], [0], [0], [1], [0, 0, 1, 1], [], []>} : vector<8x128xf32>, vector<128x384xf32>, vector<8x384xf32> -> vector<8x384xf32>
    %231 = vector.extract_strided_slice %229 {offsets = [0, 0], sizes = [8, 128], strides = [1, 1]} : vector<8x384xf32> to vector<8x128xf32>
    %232 = vector.extract_strided_slice %230 {offsets = [0, 0], sizes = [8, 128], strides = [1, 1]} : vector<8x384xf32> to vector<8x128xf32>
    %233 = arith.addf %231, %232 : vector<8x128xf32>
    %cst_76 = arith.constant 5.000000e-01 : f32
    %234 = vector.broadcast %cst_76 : f32 to vector<8x128xf32>
    %235 = arith.mulf %234, %233 : vector<8x128xf32>
    %236 = math.tanh %235 : vector<8x128xf32>
    %cst_77 = arith.constant 1.000000e+00 : f32
    %237 = vector.broadcast %cst_77 : f32 to vector<8x128xf32>
    %238 = arith.addf %236, %237 : vector<8x128xf32>
    %cst_78 = arith.constant 5.000000e-01 : f32
    %239 = vector.broadcast %cst_78 : f32 to vector<8x128xf32>
    %240 = arith.mulf %239, %238 : vector<8x128xf32>
    %241 = vector.extract_strided_slice %229 {offsets = [0, 128], sizes = [8, 128], strides = [1, 1]} : vector<8x384xf32> to vector<8x128xf32>
    %242 = vector.extract_strided_slice %230 {offsets = [0, 128], sizes = [8, 128], strides = [1, 1]} : vector<8x384xf32> to vector<8x128xf32>
    %243 = arith.addf %241, %242 : vector<8x128xf32>
    %cst_79 = arith.constant 5.000000e-01 : f32
    %244 = vector.broadcast %cst_79 : f32 to vector<8x128xf32>
    %245 = arith.mulf %244, %243 : vector<8x128xf32>
    %246 = math.tanh %245 : vector<8x128xf32>
    %cst_80 = arith.constant 1.000000e+00 : f32
    %247 = vector.broadcast %cst_80 : f32 to vector<8x128xf32>
    %248 = arith.addf %246, %247 : vector<8x128xf32>
    %cst_81 = arith.constant 5.000000e-01 : f32
    %249 = vector.broadcast %cst_81 : f32 to vector<8x128xf32>
    %250 = arith.mulf %249, %248 : vector<8x128xf32>
    %251 = vector.extract_strided_slice %229 {offsets = [0, 256], sizes = [8, 128], strides = [1, 1]} : vector<8x384xf32> to vector<8x128xf32>
    %252 = vector.extract_strided_slice %230 {offsets = [0, 256], sizes = [8, 128], strides = [1, 1]} : vector<8x384xf32> to vector<8x128xf32>
    %253 = vector.broadcast %9 : vector<1x128xf32> to vector<8x128xf32>
    %254 = arith.addf %252, %253 : vector<8x128xf32>
    %255 = arith.mulf %240, %254 : vector<8x128xf32>
    %256 = arith.addf %251, %255 : vector<8x128xf32>
    %257 = math.tanh %256 : vector<8x128xf32>
    %cst_82 = arith.constant 1.000000e+00 : f32
    %258 = vector.broadcast %cst_82 : f32 to vector<8x128xf32>
    %259 = arith.subf %258, %250 : vector<8x128xf32>
    %260 = arith.mulf %259, %257 : vector<8x128xf32>
    %261 = arith.mulf %250, %226 : vector<8x128xf32>
    %262 = arith.addf %260, %261 : vector<8x128xf32>
    %c7_i32 = arith.constant 7 : i32
    %263 = arith.index_cast %c7_i32 : i32 to index
    %c0_83 = arith.constant 0 : index
    %c0_84 = arith.constant 0 : index
    %264 = vector.load %arg9[%263, %c0_83, %c0_84] : memref<8x8x384xf32, #tpu.memory_space<vmem>>, vector<1x8x384xf32>
    %265 = vector.shape_cast %264 : vector<1x8x384xf32> to vector<8x384xf32>
    %cst_85 = arith.constant dense<0.000000e+00> : vector<8x384xf32>
    %266 = tpu.matmul %262, %8, %cst_85 {dimension_numbers = #tpu.dot_dimension_numbers<[1], [0], [0], [1], [0, 0, 1, 1], [], []>} : vector<8x128xf32>, vector<128x384xf32>, vector<8x384xf32> -> vector<8x384xf32>
    %267 = vector.extract_strided_slice %265 {offsets = [0, 0], sizes = [8, 128], strides = [1, 1]} : vector<8x384xf32> to vector<8x128xf32>
    %268 = vector.extract_strided_slice %266 {offsets = [0, 0], sizes = [8, 128], strides = [1, 1]} : vector<8x384xf32> to vector<8x128xf32>
    %269 = arith.addf %267, %268 : vector<8x128xf32>
    %cst_86 = arith.constant 5.000000e-01 : f32
    %270 = vector.broadcast %cst_86 : f32 to vector<8x128xf32>
    %271 = arith.mulf %270, %269 : vector<8x128xf32>
    %272 = math.tanh %271 : vector<8x128xf32>
    %cst_87 = arith.constant 1.000000e+00 : f32
    %273 = vector.broadcast %cst_87 : f32 to vector<8x128xf32>
    %274 = arith.addf %272, %273 : vector<8x128xf32>
    %cst_88 = arith.constant 5.000000e-01 : f32
    %275 = vector.broadcast %cst_88 : f32 to vector<8x128xf32>
    %276 = arith.mulf %275, %274 : vector<8x128xf32>
    %277 = vector.extract_strided_slice %265 {offsets = [0, 128], sizes = [8, 128], strides = [1, 1]} : vector<8x384xf32> to vector<8x128xf32>
    %278 = vector.extract_strided_slice %266 {offsets = [0, 128], sizes = [8, 128], strides = [1, 1]} : vector<8x384xf32> to vector<8x128xf32>
    %279 = arith.addf %277, %278 : vector<8x128xf32>
    %cst_89 = arith.constant 5.000000e-01 : f32
    %280 = vector.broadcast %cst_89 : f32 to vector<8x128xf32>
    %281 = arith.mulf %280, %279 : vector<8x128xf32>
    %282 = math.tanh %281 : vector<8x128xf32>
    %cst_90 = arith.constant 1.000000e+00 : f32
    %283 = vector.broadcast %cst_90 : f32 to vector<8x128xf32>
    %284 = arith.addf %282, %283 : vector<8x128xf32>
    %cst_91 = arith.constant 5.000000e-01 : f32
    %285 = vector.broadcast %cst_91 : f32 to vector<8x128xf32>
    %286 = arith.mulf %285, %284 : vector<8x128xf32>
    %287 = vector.extract_strided_slice %265 {offsets = [0, 256], sizes = [8, 128], strides = [1, 1]} : vector<8x384xf32> to vector<8x128xf32>
    %288 = vector.extract_strided_slice %266 {offsets = [0, 256], sizes = [8, 128], strides = [1, 1]} : vector<8x384xf32> to vector<8x128xf32>
    %289 = vector.broadcast %9 : vector<1x128xf32> to vector<8x128xf32>
    %290 = arith.addf %288, %289 : vector<8x128xf32>
    %291 = arith.mulf %276, %290 : vector<8x128xf32>
    %292 = arith.addf %287, %291 : vector<8x128xf32>
    %293 = math.tanh %292 : vector<8x128xf32>
    %cst_92 = arith.constant 1.000000e+00 : f32
    %294 = vector.broadcast %cst_92 : f32 to vector<8x128xf32>
    %295 = arith.subf %294, %286 : vector<8x128xf32>
    %296 = arith.mulf %295, %293 : vector<8x128xf32>
    %297 = arith.mulf %286, %262 : vector<8x128xf32>
    %298 = arith.addf %296, %297 : vector<8x128xf32>
    %c8_i32 = arith.constant 8 : i32
    %c0_93 = arith.constant 0 : index
    %c0_94 = arith.constant 0 : index
    %299 = vector.load %arg6[%c0_93, %c0_94] : memref<128x128xf32, #tpu.memory_space<vmem>>, vector<128x128xf32>
    %cst_95 = arith.constant dense<0.000000e+00> : vector<8x128xf32>
    %300 = tpu.matmul %298, %299, %cst_95 {dimension_numbers = #tpu.dot_dimension_numbers<[1], [0], [0], [1], [0, 0, 1, 1], [], []>} : vector<8x128xf32>, vector<128x128xf32>, vector<8x128xf32> -> vector<8x128xf32>
    %c0_96 = arith.constant 0 : index
    %c0_97 = arith.constant 0 : index
    %301 = vector.load %arg7[%c0_96, %c0_97] : memref<1x128xf32, #tpu.memory_space<vmem>>, vector<1x128xf32>
    %302 = vector.broadcast %301 : vector<1x128xf32> to vector<8x128xf32>
    %303 = arith.addf %300, %302 : vector<8x128xf32>
    %c0_98 = arith.constant 0 : index
    %c0_99 = arith.constant 0 : index
    %304 = vector.load %arg8[%c0_98, %c0_99] : memref<8x128xf32, #tpu.memory_space<vmem>>, vector<8x128xf32>
    tpu.vector_store %arg8[%c0_98, %c0_99], %303 {strides = array<i32>} : memref<8x128xf32, #tpu.memory_space<vmem>>, vector<8x128xf32>,
    return
  }
  func.func @transform_0(%arg0: i32) -> (i32, i32) {
    %c0_i32 = arith.constant 0 : i32
    %c0_i32_0 = arith.constant 0 : i32
    %c0_i32_1 = arith.constant 0 : i32
    return %c0_i32, %c0_i32_0 : i32, i32
  }
  func.func @transform_1(%arg0: i32) -> (i32, i32) {
    %c0_i32 = arith.constant 0 : i32
    %c0_i32_0 = arith.constant 0 : i32
    %c0_i32_1 = arith.constant 0 : i32
    return %c0_i32, %c0_i32_0 : i32, i32
  }
  func.func @transform_2(%arg0: i32) -> (i32, i32) {
    %c0_i32 = arith.constant 0 : i32
    %c0_i32_0 = arith.constant 0 : i32
    %c0_i32_1 = arith.constant 0 : i32
    return %c0_i32, %c0_i32_0 : i32, i32
  }
  func.func @transform_3(%arg0: i32) -> (i32, i32) {
    %c0_i32 = arith.constant 0 : i32
    %c0_i32_0 = arith.constant 0 : i32
    %c0_i32_1 = arith.constant 0 : i32
    return %c0_i32, %c0_i32_0 : i32, i32
  }
  func.func @transform_4(%arg0: i32) -> (i32, i32) {
    %c0_i32 = arith.constant 0 : i32
    %c0_i32_0 = arith.constant 0 : i32
    %c0_i32_1 = arith.constant 0 : i32
    return %c0_i32, %c0_i32_0 : i32, i32
  }
  func.func @transform_5(%arg0: i32) -> (i32, i32) {
    %c0_i32 = arith.constant 0 : i32
    %c0_i32_0 = arith.constant 0 : i32
    %c0_i32_1 = arith.constant 0 : i32
    return %c0_i32, %c0_i32_0 : i32, i32
  }
  func.func @transform_6(%arg0: i32) -> (i32, i32) {
    %c0_i32 = arith.constant 0 : i32
    %c0_i32_0 = arith.constant 0 : i32
    %c0_i32_1 = arith.constant 0 : i32
    return %c0_i32, %c0_i32_0 : i32, i32
  }
  func.func @transform_7(%arg0: i32) -> (i32, i32) {
    %c0_i32 = arith.constant 0 : i32
    %c0_i32_0 = arith.constant 0 : i32
    %c0_i32_1 = arith.constant 0 : i32
    return %c0_i32, %c0_i32_0 : i32, i32
  }
}

</mosaic_0001>

<bundles_post_ra>
// kernel: words_rnn_forward.1
= control target key start
LH: loop header
LB: loop body
LE: loop exit
PB: predicated region body
PF: predicated region fallthrough
CT: control target
= control target key end

     0   :  { %v2855_v3 = vmov 0.0   ;;  %vm57_vm0 = vcmask 130048   ;;  %v2856_v40 = vmov 0.0|0.0   ;;  %vm2857_vm1 = vmmov 0   ;;  %s3564_s1 = inlined_call_operand.vmem [shape: f32[16,384], index: 1, kind: input, shape index: {}]   ;;  %s3565_s0 = inlined_call_operand.vmem [shape: f32[64,16], index: 0, kind: input, shape index: {}]   ;;  %s3566_s2 = inlined_call_operand.vmem [shape: f32[128,384], index: 2, kind: input, shape index: {}]   ;;  %s3567_s3 = inlined_call_operand.vmem [shape: f32[1,384], index: 3, kind: input, shape index: {}]   ;;  %s3568_s4 = inlined_call_operand.vmem [shape: f32[1,128], index: 4, kind: input, shape index: {}]   ;;  %s3569_s5 = inlined_call_operand.vmem [shape: f32[128,128], index: 5, kind: input, shape index: {}]   ;;  %s3570_s6 = inlined_call_operand.vmem [shape: f32[1,128], index: 6, kind: input, shape index: {}]   ;;  %s3571_s7 = inlined_call_operand.vmem [shape: f32[8,128], index: 7, kind: output, shape index: {}]  }
   0x1   :  { %v35_v0 = vld [vmem:[%s3564_s1 + $0x8] sm:$0xff]  ;;  %v38_v1 = vld [vmem:[%s3564_s1 + $0x20] sm:$0xff]  ;;  %146 = vmatprep.mubr.f32.mxu0 %v2855_v3  ;;  %v37_v5 = vld [vmem:[%s3564_s1 + $0x18] sm:$0xff] }
   0x2   :  { %v34_v2 = vld [vmem:[%s3564_s1] sm:$0xff]  ;;  %v2292_v4 = vpack.c.bf16 %v38_v1, %v35_v0  ;;  %v325_v7 = vld [vmem:[%s3566_s2 + $0x8] sm:$0xff]  ;;  %v327_v11 = vld [vmem:[%s3566_s2 + $0x18] sm:$0xff] }
   0x3   :  { %v26_v6 = vld [vmem:[%s3565_s0] sm:$0xff]  ;;  %v2294_v8 = vpack.c.bf16 %v37_v5, %v34_v2  ;;  %v331_v13 = vld [vmem:[%s3566_s2 + $0x38] sm:$0xff]  ;;  %v334_v14 = vld [vmem:[%s3566_s2 + $0x50] sm:$0xff] }
   0x4   :  { %v328_v9 = vld [vmem:[%s3566_s2 + $0x20] sm:$0xff]  ;;  %1965 = vmatprep.mubr.msk.f32.mxu1 %vm57_vm0, %v26_v6  ;;  %2293 = vmatprep.subr.bf16.mxu0 %v2292_v4  ;;  %v2938_v16 = vpack.c.bf16 %v334_v14, %v331_v13  ;;  %v330_v17 = vld [vmem:[%s3566_s2 + $0x30] sm:$0xff]  ;;  %v333_v18 = vld [vmem:[%s3566_s2 + $0x48] sm:$0xff] }
   0x5   :  { %v324_v10 = vld [vmem:[%s3566_s2] sm:$0xff]  ;;  %v2927_v12 = vpack.c.bf16 %v328_v9, %v325_v7  ;;  %2295 = vmatpush1.bf16.msra.mxu0 %v2294_v8  ;;  %v337_v19 = vld [vmem:[%s3566_s2 + $0x68] sm:$0xff]  ;;  %v36_v21 = vld [vmem:[%s3564_s1 + $0x10] sm:$0xff]  ;;  %v2964_v24 = vpack.c.bf16 %v333_v18, %v330_v17 }
   0x6   :  { %v2935_v15 = vpack.c.bf16 %v327_v11, %v324_v10  ;;  %v340_v20 = vld [vmem:[%s3566_s2 + $0x80] sm:$0xff]  ;;  %v39_v22 = vld [vmem:[%s3564_s1 + $0x28] sm:$0xff]  ;;  %v339_v28 = vld [vmem:[%s3566_s2 + $0x78] sm:$0xff] }
   0x7   :  { %2301 = vmatprep.subr.bf16.mxu0 %v2927_v12  ;;  %v27_v23 = vld [vmem:[%s3565_s0 + $0x8] sm:$0xff]  ;;  %v2296_v25 = vpack.c.bf16 %v39_v22, %v36_v21  ;;  %v2967_v26 = vpack.c.bf16 %v340_v20, %v337_v19  ;;  %v336_v27 = vld [vmem:[%s3566_s2 + $0x60] sm:$0xff]  ;;  %v343_v29 = vld [vmem:[%s3566_s2 + $0x98] sm:$0xff] }
   0x8   :  { %1780 = vmatmul.mubr.msk.f32.vlgmr.msra.gmra.mrb[0].mxu0 %vm57_vm0, %v26_v6  ;;  %v346_v30 = vld [vmem:[%s3566_s2 + $0xb0] sm:$0xff]  ;;  %v329_v32 = vld [vmem:[%s3566_s2 + $0x28] sm:$0xff]  ;;  %v2995_v35 = vpack.c.bf16 %v339_v28, %v336_v27  ;;  %v332_v36 = vld [vmem:[%s3566_s2 + $0x40] sm:$0xff] }
   0x9   :  { %2303 = vmatpush1.bf16.msra.mxu0 %v2935_v15  ;;  %152 = vmatprep.mubr.f32.mxu0 %v2855_v3  ;;  %v326_v31 = vld [vmem:[%s3566_s2 + $0x10] sm:$0xff]  ;;  %v3001_v37 = vpack.c.bf16 %v346_v30, %v343_v29  ;;  %v345_v39 = vld [vmem:[%s3566_s2 + $0xa8] sm:$0xff]  ;;  %v335_v41 = vld [vmem:[%s3566_s2 + $0x58] sm:$0xff] }
   0xa   :  { %2305 = vmatprep.subr.bf16.mxu0 %v2938_v16  ;;  %2297 = vmatprep.subr.bf16.mxu1 %v2296_v25  ;;  %v2988_v33 = vpack.c.bf16 %v329_v32, %v326_v31  ;;  %v28_v34 = vld [vmem:[%s3565_s0 + $0x10] sm:$0xff]  ;;  %v349_v42 = vld [vmem:[%s3566_s2 + $0xc8] sm:$0xff]  ;;  %v352_v43 = vld [vmem:[%s3566_s2 + $0xe0] sm:$0xff]  ;;  %v3022_v44 = vpack.c.bf16 %v335_v41, %v332_v36 }
   0xb   :  { %2299 = vmatpush3.bf16.msra.mxu1 %v2296_v25  ;;  %v342_v38 = vld [vmem:[%s3566_s2 + $0x90] sm:$0xff]  ;;  %v29_v45 = vld [vmem:[%s3565_s0 + $0x18] sm:$0xff]  ;;  %v341_v48 = vld [vmem:[%s3566_s2 + $0x88] sm:$0xff]  ;;  %v3038_v49 = vpack.c.bf16 %v352_v43, %v349_v42 }
   0xc   :  { %1781 = vmatmul.mubr.msk.f32.gmra.mrb[2].mxu0 %vm57_vm0, %v27_v23  ;;  %2332 = vmatprep.subr.bf16.mxu1 %v2856_v40  ;;  %v3029_v46 = vpack.c.bf16 %v345_v39, %v342_v38  ;;  %v338_v47 = vld [vmem:[%s3566_s2 + $0x70] sm:$0xff]  ;;  %v348_v50 = vld [vmem:[%s3566_s2 + $0xc0] sm:$0xff]  ;;  %v351_v51 = vld [vmem:[%s3566_s2 + $0xd8] sm:$0xff] }
   0xd   :  { %2307 = vmatpush1.bf16.msra.mxu0 %v2964_v24  ;;  %158 = vmatprep.mubr.f32.mxu0 %v2855_v3  ;;  %v355_v52 = vld [vmem:[%s3566_s2 + $0xf8] sm:$0xff]  ;;  %v358_v53 = vld [vmem:[%s3566_s2 + $0x110] sm:$0xff]  ;;  %v3056_v54 = vpack.c.bf16 %v341_v48, %v338_v47  ;;  %v30_v55 = vld [vmem:[%s3565_s0 + $0x20] sm:$0xff]  ;;  %v3063_v56 = vpack.c.bf16 %v351_v51, %v348_v50 }
   0xe   :  { %2309 = vmatprep.subr.bf16.mxu0 %v2967_v26  ;;  %1966 = vmatmul.mubr.msk.f32.vlgmr.msra.gmra.mrb[0].mxu1 %vm57_vm0, %v27_v23  ;;  %v344_v57 = vld [vmem:[%s3566_s2 + $0xa0] sm:$0xff]  ;;  %v347_v58 = vld [vmem:[%s3566_s2 + $0xb8] sm:$0xff]  ;;  %v3072_v59 = vpack.c.bf16 %v358_v53, %v355_v52  ;;  %v354_v60 = vld [vmem:[%s3566_s2 + $0xf0] sm:$0xff] }
   0xf   :  { %2334 = vmatpush3.bf16.msra.mxu1 %v2988_v33  ;;  %1968 = vmatprep.mubr.msk.f32.mxu1 %vm57_vm0, %v28_v34  ;;  %v357_v61 = vld [vmem:[%s3566_s2 + $0x108] sm:$0xff]  ;;  %v364_v63 = vld [vmem:[%s3566_s2 + $0x140] sm:$0xff]  ;;  %v3090_v0 = vpack.c.bf16 %v347_v58, %v344_v57  ;;  %v350_v4 = vld [vmem:[%s3566_s2 + $0xd0] sm:$0xff] }
  0x10   :  { %1782 = vmatmul.mubr.msk.f32.gmra.mrb[4].mxu0 %vm57_vm0, %v28_v34  ;;  %2335 = vmatprep.subr.bf16.mxu1 %v2856_v40  ;;  %v361_v62 = vld [vmem:[%s3566_s2 + $0x128] sm:$0xff]  ;;  %v3097_v2 = vpack.c.bf16 %v357_v61, %v354_v60  ;;  %v360_v7 = vld [vmem:[%s3566_s2 + $0x120] sm:$0xff]  ;;  %v363_v8 = vld [vmem:[%s3566_s2 + $0x138] sm:$0xff]  ;;  %v42_v34 = vlaneseq }
  0x11   :  { %2311 = vmatpush1.bf16.msra.mxu0 %v2995_v35  ;;  %164 = vmatprep.mubr.f32.mxu0 %v2855_v3  ;;  %v31_v1 = vld [vmem:[%s3565_s0 + $0x28] sm:$0xff]  ;;  %v3106_v6 = vpack.c.bf16 %v364_v63, %v361_v62  ;;  %v367_v9 = vld [vmem:[%s3566_s2 + $0x158] sm:$0xff]  ;;  %v370_v10 = vld [vmem:[%s3566_s2 + $0x170] sm:$0xff]  ;;  %v3131_v14 = vpack.c.bf16 %v363_v8, %v360_v7 }
  0x12   :  { %2313 = vmatprep.subr.bf16.mxu0 %v3001_v37  ;;  %1969 = vmatmul.mubr.msk.f32.gmra.mrb[2].mxu1 %vm57_vm0, %v29_v45  ;;  %v353_v5 = vld [vmem:[%s3566_s2 + $0xe8] sm:$0xff]  ;;  %v32_v13 = vld [vmem:[%s3565_s0 + $0x30] sm:$0xff]  ;;  %v356_v17 = vld [vmem:[%s3566_s2 + $0x100] sm:$0xff]  ;;  %v3140_v19 = vpack.c.bf16 %v370_v10, %v367_v9  ;;  %v43_v36 = vshrl.u32 %v42_v34, 7 }
  0x13   :  { %2337 = vmatpush3.bf16.msra.mxu1 %v3022_v44  ;;  %1971 = vmatprep.mubr.msk.f32.mxu1 %vm57_vm0, %v30_v55  ;;  %v3124_v11 = vpack.c.bf16 %v353_v5, %v350_v4  ;;  %v359_v18 = vld [vmem:[%s3566_s2 + $0x118] sm:$0xff]  ;;  %v366_v20 = vld [vmem:[%s3566_s2 + $0x150] sm:$0xff]  ;;  %v369_v21 = vld [vmem:[%s3566_s2 + $0x168] sm:$0xff] }
  0x14   :  { %1783 = vmatmul.mubr.msk.f32.gmra.mrb[6].mxu0 %vm57_vm0, %v29_v45  ;;  %2338 = vmatprep.subr.bf16.mxu1 %v2856_v40  ;;  %v3152_v22 = vpack.c.bf16 %v359_v18, %v356_v17  ;;  %v33_v23 = vld [vmem:[%s3565_s0 + $0x38] sm:$0xff]  ;;  %v3159_v25 = vpack.c.bf16 %v369_v21, %v366_v20  ;;  %v362_v27 = vld [vmem:[%s3566_s2 + $0x130] sm:$0xff]  ;;  %v365_v28 = vld [vmem:[%s3566_s2 + $0x148] sm:$0xff]  ;;  %v52_v38 = vsub.s32 2, %v43_v36  ;;  %v44_v57 = vsub.s32 0, %v43_v36 }
  0x15   :  { %2315 = vmatpush1.bf16.msra.mxu0 %v3029_v46  ;;  %170 = vmatprep.mubr.f32.mxu0 %v2855_v3  ;;  %v3172_v29 = vpack.c.bf16 %v365_v28, %v362_v27  ;;  %v368_v30 = vld [vmem:[%s3566_s2 + $0x160] sm:$0xff]  ;;  %v371_v31 = vld [vmem:[%s3566_s2 + $0x178] sm:$0xff]  ;;  %v48_v60 = vsub.s32 1, %v43_v36 }
  0x16   :  { %2317 = vmatprep.subr.bf16.mxu0 %v3038_v49  ;;  %1972 = vmatmul.mubr.msk.f32.gmra.mrb[4].mxu1 %vm57_vm0, %v31_v1  ;;  %v3189_v32 = vpack.c.bf16 %v371_v31, %v368_v30  ;;  %v40_v39 = vld [vmem:[%s3567_s3] sm:$0x7] }
  0x17   :  { %2340 = vmatpush3.bf16.msra.mxu1 %v3056_v54  ;;  %1974 = vmatprep.mubr.msk.f32.mxu1 %vm57_vm0, %v32_v13  ;;  %v53_v41 = vrot.slane %v40_v39, %v52_v38  ;;  %v3243_v61 = vrot.slane %v40_v39, %v44_v57  ;;  %v3247_v5 = vrot.slane %v40_v39, %v48_v60  ;;  %v3256_v21 = vld [vmem:[%s3568_s4] ss:$0 sm:$0xff] }
  0x18   :  { %1784 = vmatmul.mubr.msk.f32.gmra.mrb[8].mxu0 %vm57_vm0, %v30_v55  ;;  %2341 = vmatprep.subr.bf16.mxu1 %v2856_v40 }
  0x19   :  { %2319 = vmatpush1.bf16.msra.mxu0 %v3063_v56  ;;  %176 = vmatprep.mubr.f32.mxu0 %v2855_v3 }
  0x1a   :  { %2321 = vmatprep.subr.bf16.mxu0 %v3072_v59  ;;  %1975 = vmatmul.mubr.msk.f32.gmra.mrb[6].mxu1 %vm57_vm0, %v33_v23 }
  0x1b   :  { %2343 = vmatpush3.bf16.msra.mxu1 %v3090_v0  ;;  %2009 = vmatprep.mubr.msk.f32.mxu1 %vm2857_vm1, %v2855_v3 }
  0x1c   :  { %1785 = vmatmul.mubr.msk.f32.gmra.mrb[10].mxu0 %vm57_vm0, %v31_v1  ;;  %2344 = vmatprep.subr.bf16.mxu1 %v2856_v40 }
  0x1d   :  { %2323 = vmatpush1.bf16.msra.mxu0 %v3097_v2  ;;  %182 = vmatprep.mubr.f32.mxu0 %v2855_v3 }
  0x1e   :  { %2325 = vmatprep.subr.bf16.mxu0 %v3106_v6 }
  0x1f   :  { %2346 = vmatpush3.bf16.msra.mxu1 %v3124_v11 }
  0x20   :  { %1786 = vmatmul.mubr.msk.f32.gmra.mrb[12].mxu0 %vm57_vm0, %v32_v13  ;;  %2347 = vmatprep.subr.bf16.mxu1 %v2856_v40 }
  0x21   :  { %2327 = vmatpush1.bf16.msra.mxu0 %v3131_v14  ;;  %188 = vmatprep.mubr.f32.mxu0 %v2855_v3 }
  0x22   :  { %2329 = vmatprep.subr.bf16.mxu0 %v3140_v19 }
  0x23   :  { %2349 = vmatpush3.bf16.msra.mxu1 %v3152_v22 }
  0x24   :  { %1787 = vmatmul.mubr.msk.f32.gmra.mrb[14].mxu0 %vm57_vm0, %v33_v23  ;;  %2350 = vmatprep.subr.bf16.mxu1 %v2856_v40 }
  0x25   :  { %2331 = vmatpush1.bf16.msra.mxu0 %v3159_v25  ;;  %440 = vmatprep.mubr.f32.mxu0 %v2855_v3 }
  0x26   :  { %2357 = vmatprep.subr.bf16.mxu0 %v2927_v12 }
  0x27   :  { %2352 = vmatpush3.bf16.msra.mxu1 %v3172_v29 }
  0x28   :  { %441 = vmatmul.mubr.f32.vlgmr.msra.gmra.mrb[0].mxu0 %v2855_v3  ;;  %2353 = vmatprep.subr.bf16.mxu1 %v2856_v40 }
  0x29   :  { %2359 = vmatpush1.bf16.msra.mxu0 %v2935_v15  ;;  %609 = vmatprep.mubr.f32.mxu0 %v2855_v3 }
  0x2a   :  { %2361 = vmatprep.subr.bf16.mxu0 %v2938_v16 }
  0x2b   :  { %2355 = vmatpush3.bf16.msra.mxu1 %v3189_v32 }
  0x2c   :  { %2388 = vmatprep.subr.bf16.mxu1 %v2856_v40 }
  0x2d   :  { %2363 = vmatpush1.bf16.msra.mxu0 %v2964_v24 }
  0x2e   :  { %2365 = vmatprep.subr.bf16.mxu0 %v2967_v26  ;;  %2010 = vmatmul.mubr.f32.vlgmr.msra.gmra.mrb[8].mxu1 %v2855_v3 }
  0x2f   :  { %2390 = vmatpush3.bf16.msra.mxu1 %v2988_v33  ;;  %2044 = vmatprep.mubr.msk.f32.mxu1 %vm2857_vm1, %v2855_v3 }
  0x30   :  { %2391 = vmatprep.subr.bf16.mxu1 %v2856_v40 }
  0x31   :  { %2367 = vmatpush1.bf16.msra.mxu0 %v2995_v35 }
  0x32   :  { %2369 = vmatprep.subr.bf16.mxu0 %v3001_v37 }
  0x33   :  { %2393 = vmatpush3.bf16.msra.mxu1 %v3022_v44 }
  0x34   :  { %2394 = vmatprep.subr.bf16.mxu1 %v2856_v40 }
  0x35   :  { %2371 = vmatpush1.bf16.msra.mxu0 %v3029_v46 }
  0x36   :  { %2373 = vmatprep.subr.bf16.mxu0 %v3038_v49 }
  0x37   :  { %2396 = vmatpush3.bf16.msra.mxu1 %v3056_v54 }
  0x38   :  { %2397 = vmatprep.subr.bf16.mxu1 %v2856_v40 }
  0x39   :  { %2375 = vmatpush1.bf16.msra.mxu0 %v3063_v56 }
  0x3a   :  { %2377 = vmatprep.subr.bf16.mxu0 %v3072_v59 }
  0x3b   :  { %2399 = vmatpush3.bf16.msra.mxu1 %v3090_v0 }
  0x3c   :  { %2400 = vmatprep.subr.bf16.mxu1 %v2856_v40 }
  0x3d   :  { %2379 = vmatpush1.bf16.msra.mxu0 %v3097_v2 }
  0x3e   :  { %2381 = vmatprep.subr.bf16.mxu0 %v3106_v6 }
  0x3f   :  { %2402 = vmatpush3.bf16.msra.mxu1 %v3124_v11 }
  0x40   :  { %2403 = vmatprep.subr.bf16.mxu1 %v2856_v40 }
  0x41   :  { %2383 = vmatpush1.bf16.msra.mxu0 %v3131_v14 }
  0x42   :  { %2385 = vmatprep.subr.bf16.mxu0 %v3140_v19 }
  0x43   :  { %2405 = vmatpush3.bf16.msra.mxu1 %v3152_v22 }
  0x44   :  { %2406 = vmatprep.subr.bf16.mxu1 %v2856_v40 }
  0x45   :  { %2387 = vmatpush1.bf16.msra.mxu0 %v3159_v25 }
  0x46   :  { %2413 = vmatprep.subr.bf16.mxu0 %v2927_v12 }
  0x47   :  { %2408 = vmatpush3.bf16.msra.mxu1 %v3172_v29 }
  0x48   :  { %2409 = vmatprep.subr.bf16.mxu1 %v2856_v40 }
  0x4b   :  { %2411 = vmatpush3.bf16.msra.mxu1 %v3189_v32 }
  0x4c   :  { %2444 = vmatprep.subr.bf16.mxu1 %v2856_v40 }
  0xe1   :  { %v1967_v42 = vpop.f32.mrb[0].mxu1 }
  0xe2   :  { %v3233_v43 = vadd.f32 %v1967_v42, %v53_v41  ;;  %v261_v45 = vpop.f32.mrb[1].mxu1 }
  0xe3   :  { %v262_v31 = vadd.f32 %v261_v45, %v53_v41 }
  0xe5   :  { %v1970_v47 = vpop.f32.mrb[2].mxu1 }
  0xe6   :  { %v3235_v48 = vadd.f32 %v1970_v47, %v53_v41  ;;  %v271_v50 = vpop.f32.mrb[3].mxu1 }
  0xe7   :  { %v3237_v51 = vadd.f32 %v271_v50, %v53_v41 }
  0xe9   :  { %v1973_v52 = vpop.f32.mrb[4].mxu1 }
  0xea   :  { %v3239_v53 = vadd.f32 %v1973_v52, %v53_v41  ;;  %v281_v55 = vpop.f32.mrb[5].mxu1 }
  0xeb   :  { %v3241_v58 = vadd.f32 %v281_v55, %v53_v41 }
  0xed   :  { %v1976_v62 = vpop.f32.mrb[6].mxu1 }
  0xee   :  { %v3245_v63 = vadd.f32 %v1976_v62, %v53_v41  ;;  %v291_v1 = vpop.f32.mrb[7].mxu1 }
  0xef   :  { %v3249_v7 = vadd.f32 %v291_v1, %v53_v41 }
  0xfb   :  { %v442_v4 = vpop.f32.mrb[0].mxu0 }
  0xfc   :  { %v2772_v8 = vadd.f32 %v442_v4, %v3243_v61  ;;  %v444_v9 = vpop.f32.mrb[1].mxu0 }
  0xfd   :  { %v2773_v13 = vadd.f32 %v444_v9, %v3247_v5 }
  0xfe   :  { %v518_v10 = vmul.f32 0.5, %v2772_v8 }
  0xff   :  { %v523_v18 = vmul.f32 0.5, %v2773_v13 }
 0x100   :  { %2807 = vtanh.f32 %v518_v10 }
 0x101   :  { %v513_v17 = vpop.f32.mrb[8].mxu1  ;;  %2809 = vtanh.f32 %v523_v18 }
 0x102   :  { %v2011_v20 = vpop.f32.mrb[9].mxu1  ;;  %v533_v28 = vadd.f32 %v3256_v21, %v513_v17 }
 0x10a   :  { %v2808_v23 = vpop.eup %2807 }
 0x10b   :  { %v520_v27 = vadd.f32 1.0, %v2808_v23  ;;  %v2810_v36 = vpop.eup %2809 }
 0x10c   :  { %v525_v39 = vadd.f32 1.0, %v2810_v36 }
 0x10d   :  { %v521_v30 = vmul.f32 0.5, %v520_v27 }
 0x10e   :  { %v526_v42 = vmul.f32 0.5, %v525_v39 }
 0x10f   :  { %v534_v34 = vmul.f32 %v533_v28, %v521_v30 }
 0x110   :  { %v537_v47 = vsub.f32 1.0, %v526_v42  ;;  %v539_v52 = vmul.f32 0.0, %v526_v42 }
 0x111   :  { %v535_v38 = vadd.f32 %v534_v34, %v262_v31 }
 0x113   :  { %2811 = vtanh.f32 %v535_v38 }
 0x11d   :  { %v2812_v50 = vpop.eup %2811 }
 0x11e   :  { %v538_v55 = vmul.f32 %v2812_v50, %v537_v47 }
 0x120   :  { %v540_v57 = vadd.f32 %v539_v52, %v538_v55 }
 0x122   :  { %610 = vmatmul.mubr.f32.vlgmr.msra.gmra.mrb[2].mxu0 %v540_v57  ;;  %2045 = vmatmul.mubr.f32.vlgmr.msra.gmra.mrb[10].mxu1 %v540_v57 }
 0x123   :  { %2415 = vmatpush1.bf16.msra.mxu0 %v2935_v15  ;;  %2446 = vmatpush3.bf16.msra.mxu1 %v2988_v33 }
 0x124   :  { %2417 = vmatprep.subr.bf16.mxu0 %v2938_v16  ;;  %2447 = vmatprep.subr.bf16.mxu1 %v2856_v40 }
 0x125   :  { %772 = vmatprep.mubr.f32.mxu0 %v2855_v3  ;;  %2079 = vmatprep.mubr.msk.f32.mxu1 %vm2857_vm1, %v2855_v3 }
 0x127   :  { %2419 = vmatpush1.bf16.msra.mxu0 %v2964_v24  ;;  %2449 = vmatpush3.bf16.msra.mxu1 %v3022_v44 }
 0x128   :  { %2421 = vmatprep.subr.bf16.mxu0 %v2967_v26  ;;  %2450 = vmatprep.subr.bf16.mxu1 %v2856_v40 }
 0x12b   :  { %2423 = vmatpush1.bf16.msra.mxu0 %v2995_v35  ;;  %2452 = vmatpush3.bf16.msra.mxu1 %v3056_v54 }
 0x12c   :  { %2425 = vmatprep.subr.bf16.mxu0 %v3001_v37  ;;  %2453 = vmatprep.subr.bf16.mxu1 %v2856_v40 }
 0x12f   :  { %2427 = vmatpush1.bf16.msra.mxu0 %v3029_v46  ;;  %2455 = vmatpush3.bf16.msra.mxu1 %v3090_v0 }
 0x130   :  { %2429 = vmatprep.subr.bf16.mxu0 %v3038_v49  ;;  %2456 = vmatprep.subr.bf16.mxu1 %v2856_v40 }
 0x133   :  { %2431 = vmatpush1.bf16.msra.mxu0 %v3063_v56  ;;  %2458 = vmatpush3.bf16.msra.mxu1 %v3124_v11 }
 0x134   :  { %2433 = vmatprep.subr.bf16.mxu0 %v3072_v59  ;;  %2459 = vmatprep.subr.bf16.mxu1 %v2856_v40 }
 0x137   :  { %2435 = vmatpush1.bf16.msra.mxu0 %v3097_v2  ;;  %2461 = vmatpush3.bf16.msra.mxu1 %v3152_v22 }
 0x138   :  { %2437 = vmatprep.subr.bf16.mxu0 %v3106_v6  ;;  %2462 = vmatprep.subr.bf16.mxu1 %v2856_v40 }
 0x13b   :  { %2439 = vmatpush1.bf16.msra.mxu0 %v3131_v14  ;;  %2464 = vmatpush3.bf16.msra.mxu1 %v3172_v29 }
 0x13c   :  { %2441 = vmatprep.subr.bf16.mxu0 %v3140_v19  ;;  %2465 = vmatprep.subr.bf16.mxu1 %v2856_v40 }
 0x13f   :  { %2443 = vmatpush1.bf16.msra.mxu0 %v3159_v25  ;;  %2467 = vmatpush3.bf16.msra.mxu1 %v3189_v32 }
 0x140   :  { %2469 = vmatprep.subr.bf16.mxu0 %v2927_v12  ;;  %2500 = vmatprep.subr.bf16.mxu1 %v2856_v40 }
 0x1f5   :  { %v611_v41 = vpop.f32.mrb[2].mxu0  ;;  %v682_v45 = vpop.f32.mrb[10].mxu1 }
 0x1f6   :  { %v2774_v60 = vadd.f32 %v611_v41, %v3243_v61  ;;  %v613_v62 = vpop.f32.mrb[3].mxu0  ;;  %v2046_v1 = vpop.f32.mrb[11].mxu1  ;;  %v696_v18 = vadd.f32 %v3256_v21, %v682_v45 }
 0x1f7   :  { %v2775_v8 = vadd.f32 %v613_v62, %v3247_v5 }
 0x1f8   :  { %v687_v4 = vmul.f32 0.5, %v2774_v60 }
 0x1f9   :  { %v692_v9 = vmul.f32 0.5, %v2775_v8 }
 0x1fa   :  { %2813 = vtanh.f32 %v687_v4 }
 0x1fb   :  { %2815 = vtanh.f32 %v692_v9 }
 0x204   :  { %v2814_v10 = vpop.eup %2813 }
 0x205   :  { %v689_v13 = vadd.f32 1.0, %v2814_v10  ;;  %v2816_v23 = vpop.eup %2815 }
 0x206   :  { %v694_v28 = vadd.f32 1.0, %v2816_v23 }
 0x207   :  { %v690_v17 = vmul.f32 0.5, %v689_v13 }
 0x208   :  { %v695_v30 = vmul.f32 0.5, %v694_v28 }
 0x209   :  { %v697_v20 = vmul.f32 %v696_v18, %v690_v17 }
 0x20a   :  { %v700_v31 = vsub.f32 1.0, %v695_v30  ;;  %v702_v38 = vmul.f32 %v695_v30, %v540_v57 }
 0x20b   :  { %v698_v27 = vadd.f32 %v697_v20, %v3233_v43 }
 0x20d   :  { %2817 = vtanh.f32 %v698_v27 }
 0x217   :  { %v2818_v34 = vpop.eup %2817 }
 0x218   :  { %v701_v36 = vmul.f32 %v2818_v34, %v700_v31 }
 0x21a   :  { %v703_v39 = vadd.f32 %v702_v38, %v701_v36 }
 0x21c   :  { %773 = vmatmul.mubr.f32.vlgmr.msra.gmra.mrb[4].mxu0 %v703_v39  ;;  %2080 = vmatmul.mubr.f32.vlgmr.msra.gmra.mrb[12].mxu1 %v703_v39 }
 0x21d   :  { %2471 = vmatpush1.bf16.msra.mxu0 %v2935_v15  ;;  %2502 = vmatpush3.bf16.msra.mxu1 %v2988_v33 }
 0x21e   :  { %2473 = vmatprep.subr.bf16.mxu0 %v2938_v16  ;;  %2503 = vmatprep.subr.bf16.mxu1 %v2856_v40 }
 0x21f   :  { %935 = vmatprep.mubr.f32.mxu0 %v2855_v3  ;;  %2114 = vmatprep.mubr.msk.f32.mxu1 %vm2857_vm1, %v2855_v3 }
 0x221   :  { %2475 = vmatpush1.bf16.msra.mxu0 %v2964_v24  ;;  %2505 = vmatpush3.bf16.msra.mxu1 %v3022_v44 }
 0x222   :  { %2477 = vmatprep.subr.bf16.mxu0 %v2967_v26  ;;  %2506 = vmatprep.subr.bf16.mxu1 %v2856_v40 }
 0x225   :  { %2479 = vmatpush1.bf16.msra.mxu0 %v2995_v35  ;;  %2508 = vmatpush3.bf16.msra.mxu1 %v3056_v54 }
 0x226   :  { %2481 = vmatprep.subr.bf16.mxu0 %v3001_v37  ;;  %2509 = vmatprep.subr.bf16.mxu1 %v2856_v40 }
 0x229   :  { %2483 = vmatpush1.bf16.msra.mxu0 %v3029_v46  ;;  %2511 = vmatpush3.bf16.msra.mxu1 %v3090_v0 }
 0x22a   :  { %2485 = vmatprep.subr.bf16.mxu0 %v3038_v49  ;;  %2512 = vmatprep.subr.bf16.mxu1 %v2856_v40 }
 0x22d   :  { %2487 = vmatpush1.bf16.msra.mxu0 %v3063_v56  ;;  %2514 = vmatpush3.bf16.msra.mxu1 %v3124_v11 }
 0x22e   :  { %2489 = vmatprep.subr.bf16.mxu0 %v3072_v59  ;;  %2515 = vmatprep.subr.bf16.mxu1 %v2856_v40 }
 0x231   :  { %2491 = vmatpush1.bf16.msra.mxu0 %v3097_v2  ;;  %2517 = vmatpush3.bf16.msra.mxu1 %v3152_v22 }
 0x232   :  { %2493 = vmatprep.subr.bf16.mxu0 %v3106_v6  ;;  %2518 = vmatprep.subr.bf16.mxu1 %v2856_v40 }
 0x235   :  { %2495 = vmatpush1.bf16.msra.mxu0 %v3131_v14  ;;  %2520 = vmatpush3.bf16.msra.mxu1 %v3172_v29 }
 0x236   :  { %2497 = vmatprep.subr.bf16.mxu0 %v3140_v19  ;;  %2521 = vmatprep.subr.bf16.mxu1 %v2856_v40 }
 0x239   :  { %2499 = vmatpush1.bf16.msra.mxu0 %v3159_v25  ;;  %2523 = vmatpush3.bf16.msra.mxu1 %v3189_v32 }
 0x23a   :  { %2525 = vmatprep.subr.bf16.mxu0 %v2927_v12  ;;  %2556 = vmatprep.subr.bf16.mxu1 %v2856_v40 }
 0x2ef   :  { %v774_v43 = vpop.f32.mrb[4].mxu0  ;;  %v845_v42 = vpop.f32.mrb[12].mxu1 }
 0x2f0   :  { %v2776_v47 = vadd.f32 %v774_v43, %v3243_v61  ;;  %v776_v50 = vpop.f32.mrb[5].mxu0  ;;  %v2081_v52 = vpop.f32.mrb[13].mxu1  ;;  %v859_v1 = vadd.f32 %v3256_v21, %v845_v42 }
 0x2f1   :  { %v2777_v57 = vadd.f32 %v776_v50, %v3247_v5 }
 0x2f2   :  { %v850_v55 = vmul.f32 0.5, %v2776_v47 }
 0x2f3   :  { %v855_v41 = vmul.f32 0.5, %v2777_v57 }
 0x2f4   :  { %2819 = vtanh.f32 %v850_v55 }
 0x2f5   :  { %2821 = vtanh.f32 %v855_v41 }
 0x2fe   :  { %v2820_v45 = vpop.eup %2819 }
 0x2ff   :  { %v852_v60 = vadd.f32 1.0, %v2820_v45  ;;  %v2822_v8 = vpop.eup %2821 }
 0x300   :  { %v857_v10 = vadd.f32 1.0, %v2822_v8 }
 0x301   :  { %v853_v62 = vmul.f32 0.5, %v852_v60 }
 0x302   :  { %v858_v13 = vmul.f32 0.5, %v857_v10 }
 0x303   :  { %v860_v4 = vmul.f32 %v859_v1, %v853_v62 }
 0x304   :  { %v863_v17 = vsub.f32 1.0, %v858_v13  ;;  %v865_v23 = vmul.f32 %v858_v13, %v703_v39 }
 0x305   :  { %v861_v9 = vadd.f32 %v860_v4, %v3237_v51 }
 0x307   :  { %2823 = vtanh.f32 %v861_v9 }
 0x311   :  { %v2824_v18 = vpop.eup %2823 }
 0x312   :  { %v864_v20 = vmul.f32 %v2824_v18, %v863_v17 }
 0x314   :  { %v866_v27 = vadd.f32 %v865_v23, %v864_v20 }
 0x316   :  { %936 = vmatmul.mubr.f32.vlgmr.msra.gmra.mrb[6].mxu0 %v866_v27  ;;  %2115 = vmatmul.mubr.f32.vlgmr.msra.gmra.mrb[14].mxu1 %v866_v27 }
 0x317   :  { %2527 = vmatpush1.bf16.msra.mxu0 %v2935_v15  ;;  %2558 = vmatpush3.bf16.msra.mxu1 %v2988_v33 }
 0x318   :  { %2529 = vmatprep.subr.bf16.mxu0 %v2938_v16  ;;  %2559 = vmatprep.subr.bf16.mxu1 %v2856_v40 }
 0x319   :  { %1098 = vmatprep.mubr.f32.mxu0 %v2855_v3  ;;  %2149 = vmatprep.mubr.msk.f32.mxu1 %vm2857_vm1, %v2855_v3 }
 0x31b   :  { %2531 = vmatpush1.bf16.msra.mxu0 %v2964_v24  ;;  %2561 = vmatpush3.bf16.msra.mxu1 %v3022_v44 }
 0x31c   :  { %2533 = vmatprep.subr.bf16.mxu0 %v2967_v26  ;;  %2562 = vmatprep.subr.bf16.mxu1 %v2856_v40 }
 0x31f   :  { %2535 = vmatpush1.bf16.msra.mxu0 %v2995_v35  ;;  %2564 = vmatpush3.bf16.msra.mxu1 %v3056_v54 }
 0x320   :  { %2537 = vmatprep.subr.bf16.mxu0 %v3001_v37  ;;  %2565 = vmatprep.subr.bf16.mxu1 %v2856_v40 }
 0x323   :  { %2539 = vmatpush1.bf16.msra.mxu0 %v3029_v46  ;;  %2567 = vmatpush3.bf16.msra.mxu1 %v3090_v0 }
 0x324   :  { %2541 = vmatprep.subr.bf16.mxu0 %v3038_v49  ;;  %2568 = vmatprep.subr.bf16.mxu1 %v2856_v40 }
 0x327   :  { %2543 = vmatpush1.bf16.msra.mxu0 %v3063_v56  ;;  %2570 = vmatpush3.bf16.msra.mxu1 %v3124_v11 }
 0x328   :  { %2545 = vmatprep.subr.bf16.mxu0 %v3072_v59  ;;  %2571 = vmatprep.subr.bf16.mxu1 %v2856_v40 }
 0x32b   :  { %2547 = vmatpush1.bf16.msra.mxu0 %v3097_v2  ;;  %2573 = vmatpush3.bf16.msra.mxu1 %v3152_v22 }
 0x32c   :  { %2549 = vmatprep.subr.bf16.mxu0 %v3106_v6  ;;  %2574 = vmatprep.subr.bf16.mxu1 %v2856_v40 }
 0x32f   :  { %2551 = vmatpush1.bf16.msra.mxu0 %v3131_v14  ;;  %2576 = vmatpush3.bf16.msra.mxu1 %v3172_v29 }
 0x330   :  { %2553 = vmatprep.subr.bf16.mxu0 %v3140_v19  ;;  %2577 = vmatprep.subr.bf16.mxu1 %v2856_v40 }
 0x333   :  { %2555 = vmatpush1.bf16.msra.mxu0 %v3159_v25  ;;  %2579 = vmatpush3.bf16.msra.mxu1 %v3189_v32 }
 0x334   :  { %2581 = vmatprep.subr.bf16.mxu0 %v2927_v12  ;;  %2612 = vmatprep.subr.bf16.mxu1 %v2856_v40 }
 0x3e9   :  { %v937_v51 = vpop.f32.mrb[6].mxu0  ;;  %v1008_v28 = vpop.f32.mrb[14].mxu1 }
 0x3ea   :  { %v2778_v30 = vadd.f32 %v937_v51, %v3243_v61  ;;  %v939_v31 = vpop.f32.mrb[7].mxu0  ;;  %v2116_v34 = vpop.f32.mrb[15].mxu1  ;;  %v1022_v50 = vadd.f32 %v3256_v21, %v1008_v28 }
 0x3eb   :  { %v2779_v38 = vadd.f32 %v939_v31, %v3247_v5 }
 0x3ec   :  { %v1013_v36 = vmul.f32 0.5, %v2778_v30 }
 0x3ed   :  { %v1018_v39 = vmul.f32 0.5, %v2779_v38 }
 0x3ee   :  { %2825 = vtanh.f32 %v1013_v36 }
 0x3ef   :  { %2827 = vtanh.f32 %v1018_v39 }
 0x3f8   :  { %v2826_v43 = vpop.eup %2825 }
 0x3f9   :  { %v1015_v42 = vadd.f32 1.0, %v2826_v43  ;;  %v2828_v55 = vpop.eup %2827 }
 0x3fa   :  { %v1020_v41 = vadd.f32 1.0, %v2828_v55 }
 0x3fb   :  { %v1016_v47 = vmul.f32 0.5, %v1015_v42 }
 0x3fc   :  { %v1021_v45 = vmul.f32 0.5, %v1020_v41 }
 0x3fd   :  { %v1023_v52 = vmul.f32 %v1022_v50, %v1016_v47 }
 0x3fe   :  { %v1026_v60 = vsub.f32 1.0, %v1021_v45  ;;  %v1028_v4 = vmul.f32 %v1021_v45, %v866_v27 }
 0x3ff   :  { %v1024_v57 = vadd.f32 %v1023_v52, %v3235_v48 }
 0x401   :  { %2829 = vtanh.f32 %v1024_v57 }
 0x40b   :  { %v2830_v62 = vpop.eup %2829 }
 0x40c   :  { %v1027_v1 = vmul.f32 %v2830_v62, %v1026_v60 }
 0x40e   :  { %v1029_v8 = vadd.f32 %v1028_v4, %v1027_v1 }
 0x410   :  { %1099 = vmatmul.mubr.f32.vlgmr.msra.gmra.mrb[8].mxu0 %v1029_v8  ;;  %2150 = vmatmul.mubr.f32.vlgmr.msra.gmra.mrb[16].mxu1 %v1029_v8 }
 0x411   :  { %2583 = vmatpush1.bf16.msra.mxu0 %v2935_v15  ;;  %2614 = vmatpush3.bf16.msra.mxu1 %v2988_v33 }
 0x412   :  { %2585 = vmatprep.subr.bf16.mxu0 %v2938_v16  ;;  %2615 = vmatprep.subr.bf16.mxu1 %v2856_v40 }
 0x413   :  { %1261 = vmatprep.mubr.f32.mxu0 %v2855_v3  ;;  %2184 = vmatprep.mubr.msk.f32.mxu1 %vm2857_vm1, %v2855_v3 }
 0x415   :  { %2587 = vmatpush1.bf16.msra.mxu0 %v2964_v24  ;;  %2617 = vmatpush3.bf16.msra.mxu1 %v3022_v44 }
 0x416   :  { %2589 = vmatprep.subr.bf16.mxu0 %v2967_v26  ;;  %2618 = vmatprep.subr.bf16.mxu1 %v2856_v40 }
 0x419   :  { %2591 = vmatpush1.bf16.msra.mxu0 %v2995_v35  ;;  %2620 = vmatpush3.bf16.msra.mxu1 %v3056_v54 }
 0x41a   :  { %2593 = vmatprep.subr.bf16.mxu0 %v3001_v37  ;;  %2621 = vmatprep.subr.bf16.mxu1 %v2856_v40 }
 0x41d   :  { %2595 = vmatpush1.bf16.msra.mxu0 %v3029_v46  ;;  %2623 = vmatpush3.bf16.msra.mxu1 %v3090_v0 }
 0x41e   :  { %2597 = vmatprep.subr.bf16.mxu0 %v3038_v49  ;;  %2624 = vmatprep.subr.bf16.mxu1 %v2856_v40 }
 0x421   :  { %2599 = vmatpush1.bf16.msra.mxu0 %v3063_v56  ;;  %2626 = vmatpush3.bf16.msra.mxu1 %v3124_v11 }
 0x422   :  { %2601 = vmatprep.subr.bf16.mxu0 %v3072_v59  ;;  %2627 = vmatprep.subr.bf16.mxu1 %v2856_v40 }
 0x425   :  { %2603 = vmatpush1.bf16.msra.mxu0 %v3097_v2  ;;  %2629 = vmatpush3.bf16.msra.mxu1 %v3152_v22 }
 0x426   :  { %2605 = vmatprep.subr.bf16.mxu0 %v3106_v6  ;;  %2630 = vmatprep.subr.bf16.mxu1 %v2856_v40 }
 0x429   :  { %2607 = vmatpush1.bf16.msra.mxu0 %v3131_v14  ;;  %2632 = vmatpush3.bf16.msra.mxu1 %v3172_v29 }
 0x42a   :  { %2609 = vmatprep.subr.bf16.mxu0 %v3140_v19  ;;  %2633 = vmatprep.subr.bf16.mxu1 %v2856_v40 }
 0x42d   :  { %2611 = vmatpush1.bf16.msra.mxu0 %v3159_v25  ;;  %2635 = vmatpush3.bf16.msra.mxu1 %v3189_v32 }
 0x42e   :  { %2637 = vmatprep.subr.bf16.mxu0 %v2927_v12  ;;  %2668 = vmatprep.subr.bf16.mxu1 %v2856_v40 }
 0x4e3   :  { %v1100_v48 = vpop.f32.mrb[8].mxu0  ;;  %v1171_v9 = vpop.f32.mrb[16].mxu1 }
 0x4e4   :  { %v2780_v10 = vadd.f32 %v1100_v48, %v3243_v61  ;;  %v1102_v13 = vpop.f32.mrb[9].mxu0  ;;  %v2151_v17 = vpop.f32.mrb[17].mxu1  ;;  %v1185_v30 = vadd.f32 %v3256_v21, %v1171_v9 }
 0x4e5   :  { %v2781_v20 = vadd.f32 %v1102_v13, %v3247_v5 }
 0x4e6   :  { %v1176_v18 = vmul.f32 0.5, %v2780_v10 }
 0x4e7   :  { %v1181_v23 = vmul.f32 0.5, %v2781_v20 }
 0x4e8   :  { %2831 = vtanh.f32 %v1176_v18 }
 0x4e9   :  { %2833 = vtanh.f32 %v1181_v23 }
 0x4f2   :  { %v2832_v27 = vpop.eup %2831 }
 0x4f3   :  { %v1178_v51 = vadd.f32 1.0, %v2832_v27  ;;  %v2834_v34 = vpop.eup %2833 }
 0x4f4   :  { %v1183_v38 = vadd.f32 1.0, %v2834_v34  ;;  %v1686_v34 = vld [vmem:[%s3569_s5 + $0x20] sm:$0xff] }
 0x4f5   :  { %v1179_v28 = vmul.f32 0.5, %v1178_v51 }
 0x4f6   :  { %v1184_v39 = vmul.f32 0.5, %v1183_v38 }
 0x4f7   :  { %v1186_v31 = vmul.f32 %v1185_v30, %v1179_v28  ;;  %v1684_v30 = vld [vmem:[%s3569_s5 + $0x10] sm:$0xff] }
 0x4f8   :  { %v1189_v43 = vsub.f32 1.0, %v1184_v39  ;;  %v1191_v50 = vmul.f32 %v1184_v39, %v1029_v8  ;;  %v1688_v39 = vld [vmem:[%s3569_s5 + $0x30] sm:$0xff] }
 0x4f9   :  { %v1187_v36 = vadd.f32 %v1186_v31, %v3241_v58 }
 0x4fb   :  { %2835 = vtanh.f32 %v1187_v36  ;;  %v1687_v36 = vld [vmem:[%s3569_s5 + $0x28] sm:$0xff] }
 0x4fc   :  { %v2755_v38 = vpack.c.bf16 %v1687_v36, %v1686_v34 }
 0x505   :  { %v2836_v42 = vpop.eup %2835 }
 0x506   :  { %v1190_v47 = vmul.f32 %v2836_v42, %v1189_v43  ;;  %v1689_v43 = vld [vmem:[%s3569_s5 + $0x38] sm:$0xff] }
 0x507   :  { %v2758_v42 = vpack.c.bf16 %v1689_v43, %v1688_v39 }
 0x508   :  { %v1192_v52 = vadd.f32 %v1191_v50, %v1190_v47  ;;  %v1690_v47 = vld [vmem:[%s3569_s5 + $0x40] sm:$0xff]  ;;  %v1691_v50 = vld [vmem:[%s3569_s5 + $0x48] sm:$0xff] }
 0x50a   :  { %1262 = vmatmul.mubr.f32.vlgmr.msra.gmra.mrb[10].mxu0 %v1192_v52  ;;  %2185 = vmatmul.mubr.f32.vlgmr.msra.gmra.mrb[18].mxu1 %v1192_v52 }
 0x50b   :  { %2639 = vmatpush1.bf16.msra.mxu0 %v2935_v15  ;;  %2670 = vmatpush3.bf16.msra.mxu1 %v2988_v33 }
 0x50c   :  { %2641 = vmatprep.subr.bf16.mxu0 %v2938_v16  ;;  %2671 = vmatprep.subr.bf16.mxu1 %v2856_v40 }
 0x50d   :  { %1424 = vmatprep.mubr.f32.mxu0 %v2855_v3  ;;  %2219 = vmatprep.mubr.msk.f32.mxu1 %vm2857_vm1, %v2855_v3 }
 0x50f   :  { %2643 = vmatpush1.bf16.msra.mxu0 %v2964_v24  ;;  %2673 = vmatpush3.bf16.msra.mxu1 %v3022_v44 }
 0x510   :  { %2645 = vmatprep.subr.bf16.mxu0 %v2967_v26  ;;  %2674 = vmatprep.subr.bf16.mxu1 %v2856_v40 }
 0x513   :  { %2647 = vmatpush1.bf16.msra.mxu0 %v2995_v35  ;;  %2676 = vmatpush3.bf16.msra.mxu1 %v3056_v54 }
 0x514   :  { %2649 = vmatprep.subr.bf16.mxu0 %v3001_v37  ;;  %2677 = vmatprep.subr.bf16.mxu1 %v2856_v40 }
 0x517   :  { %2651 = vmatpush1.bf16.msra.mxu0 %v3029_v46  ;;  %2679 = vmatpush3.bf16.msra.mxu1 %v3090_v0 }
 0x518   :  { %2653 = vmatprep.subr.bf16.mxu0 %v3038_v49  ;;  %2680 = vmatprep.subr.bf16.mxu1 %v2856_v40 }
 0x51b   :  { %2655 = vmatpush1.bf16.msra.mxu0 %v3063_v56  ;;  %2682 = vmatpush3.bf16.msra.mxu1 %v3124_v11 }
 0x51c   :  { %2657 = vmatprep.subr.bf16.mxu0 %v3072_v59  ;;  %2683 = vmatprep.subr.bf16.mxu1 %v2856_v40 }
 0x51f   :  { %2659 = vmatpush1.bf16.msra.mxu0 %v3097_v2  ;;  %2685 = vmatpush3.bf16.msra.mxu1 %v3152_v22 }
 0x520   :  { %2661 = vmatprep.subr.bf16.mxu0 %v3106_v6  ;;  %2686 = vmatprep.subr.bf16.mxu1 %v2856_v40 }
 0x523   :  { %2663 = vmatpush1.bf16.msra.mxu0 %v3131_v14  ;;  %2688 = vmatpush3.bf16.msra.mxu1 %v3172_v29 }
 0x524   :  { %2665 = vmatprep.subr.bf16.mxu0 %v3140_v19  ;;  %2689 = vmatprep.subr.bf16.mxu1 %v2856_v40 }
 0x527   :  { %2667 = vmatpush1.bf16.msra.mxu0 %v3159_v25  ;;  %2691 = vmatpush3.bf16.msra.mxu1 %v3189_v32 }
 0x528   :  { %2693 = vmatprep.subr.bf16.mxu0 %v2927_v12  ;;  %2724 = vmatprep.subr.bf16.mxu1 %v2856_v40 }
 0x5dd   :  { %v1263_v58 = vpop.f32.mrb[10].mxu0  ;;  %v1334_v55 = vpop.f32.mrb[18].mxu1 }
 0x5de   :  { %v2782_v57 = vadd.f32 %v1263_v58, %v3243_v61  ;;  %v1265_v41 = vpop.f32.mrb[11].mxu0  ;;  %v2186_v45 = vpop.f32.mrb[19].mxu1  ;;  %v1348_v9 = vadd.f32 %v3256_v21, %v1334_v55  ;;  %v1692_v58 = vld [vmem:[%s3569_s5 + $0x50] sm:$0xff]  ;;  %v1693_v55 = vld [vmem:[%s3569_s5 + $0x58] sm:$0xff] }
 0x5df   :  { %v2783_v62 = vadd.f32 %v1265_v41, %v3247_v5  ;;  %v1694_v41 = vld [vmem:[%s3569_s5 + $0x60] sm:$0xff]  ;;  %v1695_v45 = vld [vmem:[%s3569_s5 + $0x68] sm:$0xff] }
 0x5e0   :  { %v1339_v60 = vmul.f32 0.5, %v2782_v57  ;;  %v2764_v57 = vpack.c.bf16 %v1693_v55, %v1692_v58 }
 0x5e1   :  { %v1344_v1 = vmul.f32 0.5, %v2783_v62  ;;  %v1696_v62 = vld [vmem:[%s3569_s5 + $0x70] sm:$0xff] }
 0x5e2   :  { %2837 = vtanh.f32 %v1339_v60  ;;  %v2767_v60 = vpack.c.bf16 %v1695_v45, %v1694_v41 }
 0x5e3   :  { %2839 = vtanh.f32 %v1344_v1  ;;  %v1697_v1 = vld [vmem:[%s3569_s5 + $0x78] sm:$0xff] }
 0x5ec   :  { %v2838_v4 = vpop.eup %2837 }
 0x5ed   :  { %v1341_v8 = vadd.f32 1.0, %v2838_v4  ;;  %v2840_v10 = vpop.eup %2839  ;;  %v2770_v4 = vpack.c.bf16 %v1697_v1, %v1696_v62 }
 0x5ee   :  { %v1346_v17 = vadd.f32 1.0, %v2840_v10 }
 0x5ef   :  { %v1342_v48 = vmul.f32 0.5, %v1341_v8 }
 0x5f0   :  { %v1347_v18 = vmul.f32 0.5, %v1346_v17 }
 0x5f1   :  { %v1349_v12 = vmul.f32 %v1348_v9, %v1342_v48 }
 0x5f2   :  { %v1352_v20 = vsub.f32 1.0, %v1347_v18  ;;  %v1354_v51 = vmul.f32 %v1347_v18, %v1192_v52  ;;  %v2761_v52 = vpack.c.bf16 %v1691_v50, %v1690_v47 }
 0x5f3   :  { %v1350_v13 = vadd.f32 %v1349_v12, %v3239_v53  ;;  %v1683_v53 = vld [vmem:[%s3569_s5 + $0x8] sm:$0xff] }
 0x5f5   :  { %2841 = vtanh.f32 %v1350_v13 }
 0x5ff   :  { %v2842_v23 = vpop.eup %2841 }
 0x600   :  { %v1353_v27 = vmul.f32 %v2842_v23, %v1352_v20 }
 0x602   :  { %v1355_v28 = vadd.f32 %v1354_v51, %v1353_v27 }
 0x604   :  { %1425 = vmatmul.mubr.f32.vlgmr.msra.gmra.mrb[12].mxu0 %v1355_v28  ;;  %2220 = vmatmul.mubr.f32.vlgmr.msra.gmra.mrb[20].mxu1 %v1355_v28 }
 0x605   :  { %2695 = vmatpush1.bf16.msra.mxu0 %v2935_v15  ;;  %2726 = vmatpush3.bf16.msra.mxu1 %v2988_v33 }
 0x606   :  { %2697 = vmatprep.subr.bf16.mxu0 %v2938_v16  ;;  %2727 = vmatprep.subr.bf16.mxu1 %v2856_v40 }
 0x607   :  { %1587 = vmatprep.mubr.f32.mxu0 %v2855_v3  ;;  %2254 = vmatprep.mubr.msk.f32.mxu1 %vm2857_vm1, %v2855_v3 }
 0x609   :  { %2699 = vmatpush1.bf16.msra.mxu0 %v2964_v24  ;;  %2729 = vmatpush3.bf16.msra.mxu1 %v3022_v44 }
 0x60a   :  { %2701 = vmatprep.subr.bf16.mxu0 %v2967_v26  ;;  %2730 = vmatprep.subr.bf16.mxu1 %v2856_v40 }
 0x60d   :  { %2703 = vmatpush1.bf16.msra.mxu0 %v2995_v35  ;;  %2732 = vmatpush3.bf16.msra.mxu1 %v3056_v54 }
 0x60e   :  { %2705 = vmatprep.subr.bf16.mxu0 %v3001_v37  ;;  %2733 = vmatprep.subr.bf16.mxu1 %v2856_v40 }
 0x611   :  { %2707 = vmatpush1.bf16.msra.mxu0 %v3029_v46  ;;  %2735 = vmatpush3.bf16.msra.mxu1 %v3090_v0 }
 0x612   :  { %2709 = vmatprep.subr.bf16.mxu0 %v3038_v49  ;;  %2736 = vmatprep.subr.bf16.mxu1 %v2856_v40 }
 0x615   :  { %2711 = vmatpush1.bf16.msra.mxu0 %v3063_v56  ;;  %2738 = vmatpush3.bf16.msra.mxu1 %v3124_v11 }
 0x616   :  { %2713 = vmatprep.subr.bf16.mxu0 %v3072_v59  ;;  %2739 = vmatprep.subr.bf16.mxu1 %v2856_v40 }
 0x619   :  { %2715 = vmatpush1.bf16.msra.mxu0 %v3097_v2  ;;  %2741 = vmatpush3.bf16.msra.mxu1 %v3152_v22 }
 0x61a   :  { %2717 = vmatprep.subr.bf16.mxu0 %v3106_v6  ;;  %2742 = vmatprep.subr.bf16.mxu1 %v2856_v40 }
 0x61d   :  { %2719 = vmatpush1.bf16.msra.mxu0 %v3131_v14  ;;  %2744 = vmatpush3.bf16.msra.mxu1 %v3172_v29 }
 0x61e   :  { %2721 = vmatprep.subr.bf16.mxu0 %v3140_v19  ;;  %2745 = vmatprep.subr.bf16.mxu1 %v2856_v40 }
 0x621   :  { %2723 = vmatpush1.bf16.msra.mxu0 %v3159_v25  ;;  %2747 = vmatpush3.bf16.msra.mxu1 %v3189_v32  ;;  %v1682_v32 = vld [vmem:[%s3569_s5] sm:$0xff] }
 0x622   :  { %2748 = vmatprep.subr.bf16.mxu0 %v2856_v40 }
 0x6d7   :  { %v1426_v15 = vpop.f32.mrb[12].mxu0  ;;  %v1497_v16 = vpop.f32.mrb[20].mxu1 }
 0x6d8   :  { %v2784_v24 = vadd.f32 %v1426_v15, %v3243_v61  ;;  %v1428_v26 = vpop.f32.mrb[13].mxu0  ;;  %v2221_v33 = vpop.f32.mrb[21].mxu1  ;;  %v1511_v56 = vadd.f32 %v3256_v21, %v1497_v16 }
 0x6d9   :  { %v2785_v37 = vadd.f32 %v1428_v26, %v3247_v5 }
 0x6da   :  { %v1502_v35 = vmul.f32 0.5, %v2784_v24 }
 0x6db   :  { %v1507_v44 = vmul.f32 0.5, %v2785_v37  ;;  %v1797_v37 = vld [vmem:[%s3570_s6] ss:$0 sm:$0xff] }
 0x6dc   :  { %2843 = vtanh.f32 %v1502_v35 }
 0x6dd   :  { %2845 = vtanh.f32 %v1507_v44 }
 0x6e6   :  { %v2844_v46 = vpop.eup %2843 }
 0x6e7   :  { %v1504_v49 = vadd.f32 1.0, %v2844_v46  ;;  %v2846_v0 = vpop.eup %2845 }
 0x6e8   :  { %v1509_v6 = vadd.f32 1.0, %v2846_v0 }
 0x6e9   :  { %v1505_v54 = vmul.f32 0.5, %v1504_v49 }
 0x6ea   :  { %v1510_v11 = vmul.f32 0.5, %v1509_v6 }
 0x6eb   :  { %v1512_v59 = vmul.f32 %v1511_v56, %v1505_v54 }
 0x6ec   :  { %v1515_v14 = vsub.f32 1.0, %v1510_v11  ;;  %v1517_v25 = vmul.f32 %v1510_v11, %v1355_v28 }
 0x6ed   :  { %v1513_v2 = vadd.f32 %v1512_v59, %v3249_v7  ;;  %v2749_v7 = vpack.c.bf16 %v1683_v53, %v1682_v32 }
 0x6ef   :  { %2847 = vtanh.f32 %v1513_v2 }
 0x6f9   :  { %v2848_v19 = vpop.eup %2847 }
 0x6fa   :  { %v1516_v22 = vmul.f32 %v2848_v19, %v1515_v14 }
 0x6fc   :  { %v3492_v29 = vadd.f32 %v1517_v25, %v1516_v22 }
 0x6fe   :  { %1588 = vmatmul.mubr.f32.vlgmr.msra.gmra.mrb[14].mxu0 %v3492_v29  ;;  %2255 = vmatmul.mubr.f32.vlgmr.msra.gmra.mrb[22].mxu1 %v3492_v29 }
 0x6ff   :  { %2289 = vmatprep.mubr.msk.f32.mxu0 %vm2857_vm1, %v2855_v3  ;;  %2750 = vmatpush3.bf16.msra.mxu0 %v2749_v7  ;;  %v1685_v3 = vld [vmem:[%s3569_s5 + $0x18] sm:$0xff] }
 0x700   :  { %2751 = vmatprep.subr.bf16.mxu0 %v2856_v40  ;;  %v2752_v31 = vpack.c.bf16 %v1685_v3, %v1684_v30 }
 0x703   :  { %2753 = vmatpush3.bf16.msra.mxu0 %v2752_v31 }
 0x704   :  { %2754 = vmatprep.subr.bf16.mxu0 %v2856_v40 }
 0x707   :  { %2756 = vmatpush3.bf16.msra.mxu0 %v2755_v38 }
 0x708   :  { %2757 = vmatprep.subr.bf16.mxu0 %v2856_v40 }
 0x70b   :  { %2759 = vmatpush3.bf16.msra.mxu0 %v2758_v42 }
 0x70c   :  { %2760 = vmatprep.subr.bf16.mxu0 %v2856_v40 }
 0x70f   :  { %2762 = vmatpush3.bf16.msra.mxu0 %v2761_v52 }
 0x710   :  { %2763 = vmatprep.subr.bf16.mxu0 %v2856_v40 }
 0x713   :  { %2765 = vmatpush3.bf16.msra.mxu0 %v2764_v57 }
 0x714   :  { %2766 = vmatprep.subr.bf16.mxu0 %v2856_v40 }
 0x717   :  { %2768 = vmatpush3.bf16.msra.mxu0 %v2767_v60 }
 0x718   :  { %2769 = vmatprep.subr.bf16.mxu0 %v2856_v40 }
 0x71b   :  { %2771 = vmatpush3.bf16.msra.mxu0 %v2770_v4 }
 0x7d1   :  { %v1589_v8 = vpop.f32.mrb[14].mxu0  ;;  %v1660_v48 = vpop.f32.mrb[22].mxu1 }
 0x7d2   :  { %v2786_v9 = vadd.f32 %v1589_v8, %v3243_v61  ;;  %v1591_v12 = vpop.f32.mrb[15].mxu0  ;;  %v2256_v10 = vpop.f32.mrb[23].mxu1  ;;  %v1674_v27 = vadd.f32 %v3256_v21, %v1660_v48 }
 0x7d3   :  { %v2787_v17 = vadd.f32 %v1591_v12, %v3247_v5 }
 0x7d4   :  { %v1665_v13 = vmul.f32 0.5, %v2786_v9 }
 0x7d5   :  { %v1670_v40 = vmul.f32 0.5, %v2787_v17 }
 0x7d6   :  { %2849 = vtanh.f32 %v1665_v13 }
 0x7d7   :  { %2851 = vtanh.f32 %v1670_v40 }
 0x7e0   :  { %v2850_v18 = vpop.eup %2849 }
 0x7e1   :  { %v1667_v20 = vadd.f32 1.0, %v2850_v18  ;;  %v2852_v28 = vpop.eup %2851 }
 0x7e2   :  { %v1672_v16 = vadd.f32 1.0, %v2852_v28 }
 0x7e3   :  { %v1668_v23 = vmul.f32 0.5, %v1667_v20 }
 0x7e4   :  { %v1673_v61 = vmul.f32 0.5, %v1672_v16 }
 0x7e5   :  { %v1675_v51 = vmul.f32 %v1674_v27, %v1668_v23 }
 0x7e6   :  { %v1678_v24 = vsub.f32 1.0, %v1673_v61  ;;  %v1680_v5 = vmul.f32 %v1673_v61, %v3492_v29 }
 0x7e7   :  { %v1676_v15 = vadd.f32 %v1675_v51, %v3245_v63 }
 0x7e9   :  { %2853 = vtanh.f32 %v1676_v15 }
 0x7f3   :  { %v2854_v26 = vpop.eup %2853 }
 0x7f4   :  { %v1679_v33 = vmul.f32 %v2854_v26, %v1678_v24 }
 0x7f6   :  { %v1681_v35 = vadd.f32 %v1680_v5, %v1679_v33 }
 0x7f8   :  { %2290 = vmatmul.mubr.f32.vlgmr.msra.gmra.mrb[16].mxu0 %v1681_v35 }
 0x8cb   :  { %v1771_v44 = vpop.f32.mrb[16].mxu0 }
 0x8cc   :  { %v1772_v21 = vadd.f32 %v1797_v37, %v1771_v44  ;;  %v2291_v46 = vpop.f32.mrb[17].mxu0 }
 0x8ce   :  { %1775 = vst [vmem:[%s3571_s7] sm:$0xff] %v1772_v21 }

</bundles_post_ra>
